<compile_context>
chip_gen: v5e
topology: v5e:2x2
jax: 0.10.0
libtpu: 0.0.40
codegen_flags: <defaults>
</compile_context>

<pallas_src>
import functools

import jax
import jax.numpy as jnp
from jax import lax
from jax.experimental import pallas as pl
from jax.experimental.pallas import tpu as pltpu


def _round_up(x, m):
    return (x + m - 1) // m * m


def _sigmoid(x):
    # sigmoid via a single EUP tanh push (cheaper than exp + reciprocal; the
    # EUP sits on the serial h_t -> h_{t+1} critical path).
    return 0.5 * jnp.tanh(0.5 * x) + 0.5


# -----------------------------------------------------------------------------
# Pallas kernel (grid over time-chunks; h/c carried in VMEM scratch)
# -----------------------------------------------------------------------------
def lstm_clf_kernel(x_ref, wih_f_ref, whh_f_ref, b_f_ref,
                    wih_b_ref, b_b_ref, wout_ref, bout_ref,
                    out_ref, xw_scr, h_scr, c_scr, *, T):
    """Per grid step `c` (one time-chunk):
       x_ref  : (TC*Bp, E)  embedded tokens for steps [c*TC, (c+1)*TC), time-major
       wih_f/whh_f/b_f : (E,Gp4)/(Hh,Gp4)/(1,Gp4)   forward LSTM, gates packed
                          contiguously at stride Hh (order i,f,g,o), zero-padded
                          only at the end of the gate axis.
       wih_b/b_b       : (E,G3p)/(1,G3p)            backward LSTM, gates i,g,o
       wout/bout       : (2*Hh,Tp)/(1,Tp)           classifier head
       out_ref         : (Bp,Tp) log-probs (written on the last chunk only)
       xw_scr          : (TC*Bp,Gp4) f32  hoisted input projection (per chunk)
       h_scr/c_scr     : (Bp,Hh)    f32  recurrent state carried across chunks
    """
    Hh = whh_f_ref.shape[0]
    Bp = h_scr.shape[0]
    TC = x_ref.shape[0] // Bp
    chunk = pl.program_id(0)

    @pl.when(chunk == 0)
    def _():
        h_scr[...] = jnp.zeros_like(h_scr)
        c_scr[...] = jnp.zeros_like(c_scr)

    # Hoisted input projection: ONE batched MXU matmul for the whole chunk.
    xw_scr[...] = (jnp.dot(x_ref[...], wih_f_ref[...],
                           preferred_element_type=jnp.float32)
                   + b_f_ref[...])

    mdt = whh_f_ref.dtype             # matmul operand dtype (f32 or bf16)
    t0 = chunk * TC

    def step(t, carry):
        h, c = carry
        row = pl.multiple_of(t * Bp, 8)                  # aligned sublane slice
        # W_hh is re-read from VMEM each step (vld slots have slack; avoids
        # pinning it in vregs across the unrolled loop).
        z = xw_scr[pl.ds(row, Bp), :] + jnp.dot(
            h.astype(mdt), whh_f_ref[...], preferred_element_type=jnp.float32)
        i = _sigmoid(z[:, 0 * Hh:1 * Hh])                # packed gate views
        f = _sigmoid(z[:, 1 * Hh:2 * Hh])
        g = jnp.tanh(z[:, 2 * Hh:3 * Hh])
        o = _sigmoid(z[:, 3 * Hh:4 * Hh])
        c_new = f * c + i * g
        h_new = o * jnp.tanh(c_new)
        if T % TC != 0:
            # Exact 0/1 arithmetic blend masks out T-padding steps.
            m = ((t0 + t) < T).astype(jnp.float32)
            h_new = m * h_new + (1.0 - m) * h
            c_new = m * c_new + (1.0 - m) * c
        return h_new, c_new

    # Per-chunk loop is short & static -> full unroll for scheduler visibility
    # (chunking already caps the unroll length at TC).
    h, c = lax.fori_loop(0, TC, step, (h_scr[...], c_scr[...]), unroll=True)
    h_scr[...] = h
    c_scr[...] = c

    @pl.when(chunk == pl.num_programs(0) - 1)
    def _():
        # Backward direction output at position T-1. Zero initial state =>
        # h0 @ W_hh_b == 0 and f*c0 == 0, so only the i,g,o gates are computed
        # and W_hh_b is never loaded. (Only valid for zero (h0, c0).)
        off = ((T - 1) % TC) * Bp
        z_b = (jnp.dot(x_ref[pl.ds(off, Bp), :], wih_b_ref[...],
                       preferred_element_type=jnp.float32) + b_b_ref[...])
        i_b = _sigmoid(z_b[:, 0 * Hh:1 * Hh])
        g_b = jnp.tanh(z_b[:, 1 * Hh:2 * Hh])
        o_b = _sigmoid(z_b[:, 2 * Hh:3 * Hh])
        h_bwd = o_b * jnp.tanh(i_b * g_b)

        # Linear head + log_softmax, lane-dense (Bp, Tp) store.
        feat = jnp.concatenate([h, h_bwd], axis=-1)              # (Bp, 2*Hh)
        logits = (jnp.dot(feat.astype(mdt), wout_ref[...],
                          preferred_element_type=jnp.float32) + bout_ref[...])
        mx = jnp.max(logits, axis=-1, keepdims=True)
        shifted = logits - mx
        lse = jnp.log(jnp.sum(jnp.exp(shifted), axis=-1, keepdims=True))
        out_ref[...] = shifted - lse


# -----------------------------------------------------------------------------
# Wrapper: embedding gather (glue), padding to TPU-friendly layout, pallas_call
# -----------------------------------------------------------------------------
def lstm_classifier_forward(sentence, params, *, matmul_dtype=jnp.float32,
                            time_chunk=None):
    """sentence: (T, B) int32 token ids. Returns (B, target_size) log-probs.

    matmul_dtype=jnp.bfloat16 halves weight/x DMA volume and VMEM on all of
    v5e/v6e/v7x (the MXU is bf16-native everywhere); gate math and
    accumulation stay f32 either way.
    """
    # Embedding lookup is glue (data-dependent gather) done in plain JAX.
    x = params["embedding"][sentence].astype(jnp.float32)        # (T, B, E)
    T, B, E = x.shape
    Hh = params["w_hh_f"].shape[0]
    target = params["w_out"].shape[1]

    Bp = _round_up(max(B, 8), 8)        # f32 sublane tile
    G4 = 4 * Hh
    Gp4 = _round_up(G4, 128)            # packed forward gate axis (i,f,g,o)
    G3 = 3 * Hh
    G3p = _round_up(G3, 128)            # packed backward gate axis (i,g,o)
    Tp = _round_up(target, 128)         # lane-dense classifier output

    TC = time_chunk if time_chunk is not None else min(T, 8)
    nC = -(-T // TC)
    Tpad = nC * TC

    # Pad batch + time with zeros (padded time steps are masked in-kernel,
    # padded batch rows are sliced off at the end).
    x = jnp.pad(x, ((0, Tpad - T), (0, Bp - B), (0, 0)))
    xflat = x.reshape(Tpad * Bp, E).astype(matmul_dtype)         # free reshape

    # Forward weights: gates stay contiguous at stride Hh; only the total gate
    # axis is zero-padded up to a lane multiple.
    wih_f = jnp.pad(params["w_ih_f"], ((0, 0), (0, Gp4 - G4))).astype(matmul_dtype)
    whh_f = jnp.pad(params["w_hh_f"], ((0, 0), (0, Gp4 - G4))).astype(matmul_dtype)
    b_f = jnp.pad(params["b_f"], ((0, 0), (0, Gp4 - G4))).astype(jnp.float32)

    # Backward direction: keep only the live gates (i, g, o).
    wib, bbp = params["w_ih_b"], params["b_b"]
    wih_b = jnp.concatenate(
        [wib[:, 0:Hh], wib[:, 2 * Hh:3 * Hh], wib[:, 3 * Hh:4 * Hh]], axis=1)
    b_b = jnp.concatenate(
        [bbp[:, 0:Hh], bbp[:, 2 * Hh:3 * Hh], bbp[:, 3 * Hh:4 * Hh]], axis=1)
    wih_b = jnp.pad(wih_b, ((0, 0), (0, G3p - G3))).astype(matmul_dtype)
    b_b = jnp.pad(b_b, ((0, 0), (0, G3p - G3))).astype(jnp.float32)

    # Classifier head (rows [0,Hh)=forward, [Hh,2Hh)=backward); padded classes
    # get a -1e30 bias so they vanish from the log_softmax sum.
    wout = jnp.pad(params["w_out"], ((0, 0), (0, Tp - target))).astype(matmul_dtype)
    bout = jnp.full((1, Tp), -1e30, jnp.float32).at[:, :target].set(params["b_out"])

    # VMEM budget from actual buffers (inputs/outputs double-buffered by the
    # pipeliner) + headroom for compiler temporaries.
    mb = jnp.dtype(matmul_dtype).itemsize
    vmem_bytes = (
        2 * TC * Bp * E * mb                               # streamed x chunk
        + 2 * (E * Gp4 + Hh * Gp4) * mb + 2 * Gp4 * 4      # forward weights
        + 2 * E * G3p * mb + 2 * G3p * 4                   # backward weights
        + 2 * 2 * Hh * Tp * mb + 2 * Tp * 4                # head
        + 2 * Bp * Tp * 4                                  # output
        + TC * Bp * Gp4 * 4 + 2 * Bp * Hh * 4              # scratch
    )
    vmem_limit = int(2 * vmem_bytes) + (2 << 20)

    out = pl.pallas_call(
        functools.partial(lstm_clf_kernel, T=T),
        out_shape=jax.ShapeDtypeStruct((Bp, Tp), jnp.float32),
        grid=(nC,),
        in_specs=[
            pl.BlockSpec((TC * Bp, E), lambda c: (c, 0)),   # streamed x chunks
            pl.BlockSpec((E, Gp4), lambda c: (0, 0)),
            pl.BlockSpec((Hh, Gp4), lambda c: (0, 0)),
            pl.BlockSpec((1, Gp4), lambda c: (0, 0)),
            pl.BlockSpec((E, G3p), lambda c: (0, 0)),
            pl.BlockSpec((1, G3p), lambda c: (0, 0)),
            pl.BlockSpec((2 * Hh, Tp), lambda c: (0, 0)),
            pl.BlockSpec((1, Tp), lambda c: (0, 0)),
        ],
        out_specs=pl.BlockSpec((Bp, Tp), lambda c: (0, 0)),
        scratch_shapes=[
            pltpu.VMEM((TC * Bp, Gp4), jnp.float32),   # chunk input projection
            pltpu.VMEM((Bp, Hh), jnp.float32),         # h carried across chunks
            pltpu.VMEM((Bp, Hh), jnp.float32),         # c carried across chunks
        ],
        compiler_params=pltpu.CompilerParams(
            dimension_semantics=("arbitrary",),        # h/c carried => serial
            vmem_limit_bytes=vmem_limit),
    )(xflat, wih_f, whh_f, b_f, wih_b, b_b, wout, bout)

    return out[:B, :target]


# -----------------------------------------------------------------------------
# Pure-JAX reference replicating the PyTorch forward semantics
# (lstm_out[-1] -> Linear -> log_softmax over classes)
# -----------------------------------------------------------------------------
def _gate_step_ref(x_t, h, c, w_ih, w_hh, b, Hh):
    z = x_t @ w_ih + h @ w_hh + b
    i = jax.nn.sigmoid(z[:, 0 * Hh:1 * Hh])
    f = jax.nn.sigmoid(z[:, 1 * Hh:2 * Hh])
    g = jnp.tanh(z[:, 2 * Hh:3 * Hh])
    o = jax.nn.sigmoid(z[:, 3 * Hh:4 * Hh])
    c_new = f * c + i * g
    return o * jnp.tanh(c_new), c_new


def lstm_classifier_reference(sentence, params):
    x = params["embedding"][sentence].astype(jnp.float32)        # (T, B, E)
    T, B, _ = x.shape
    Hh = params["w_hh_f"].shape[0]
    h = jnp.zeros((B, Hh), jnp.float32)
    c = jnp.zeros((B, Hh), jnp.float32)
    for t in range(T):
        h, c = _gate_step_ref(x[t], h, c, params["w_ih_f"], params["w_hh_f"],
                              params["b_f"], Hh)
    # lstm_out[-1][:, Hh:] == backward LSTM after its first step (zero state).
    z0 = jnp.zeros((B, Hh), jnp.float32)
    hb, _ = _gate_step_ref(x[T - 1], z0, z0, params["w_ih_b"], params["w_hh_b"],
                           params["b_b"], Hh)
    feat = jnp.concatenate([h, hb], axis=-1)
    logits = feat @ params["w_out"] + params["b_out"]
    return jax.nn.log_softmax(logits, axis=-1)


def init_params(key, vocab_size, embedding_dim, hidden_dim, target_size):
    Hh = hidden_dim // 2
    ks = jax.random.split(key, 10)
    s = 1.0 / float(Hh) ** 0.5

    def u(k, shape):
        return jax.random.uniform(k, shape, jnp.float32, -s, s)

    return {
        # nn.Embedding(vocab_size, embedding_dim)
        "embedding": jax.random.normal(ks[0], (vocab_size, embedding_dim),
                                       jnp.float32) * 0.1,
        # nn.LSTM(embedding_dim, hidden_dim//2, bidirectional=True)
        # weights pre-transposed to (in, 4*Hh); b = b_ih + b_hh folded together.
        "w_ih_f": u(ks[1], (embedding_dim, 4 * Hh)),
        "w_hh_f": u(ks[2], (Hh, 4 * Hh)),
        "b_f":    u(ks[3], (1, 4 * Hh)),
        "w_ih_b": u(ks[4], (embedding_dim, 4 * Hh)),
        "w_hh_b": u(ks[5], (Hh, 4 * Hh)),   # kept for fidelity; unused by kernel
        "b_b":    u(ks[6], (1, 4 * Hh)),
        # nn.Linear(hidden_dim, target_size), stored transposed
        "w_out":  u(ks[7], (hidden_dim, target_size)),
        "b_out":  u(ks[8], (1, target_size)),
    }


if __name__ == "__main__":
    T, B = 8, 2
    vocab_size, embedding_dim = 50, 64
    hidden_dim, target_size = 32, 5

    key = jax.random.PRNGKey(0)
    k_param, k_tok = jax.random.split(key)
    params = init_params(k_param, vocab_size, embedding_dim,
                         hidden_dim, target_size)
    sentence = jax.random.randint(k_tok, (T, B), 0, vocab_size, jnp.int32)

    ref = lstm_classifier_reference(sentence, params)

    out = jax.block_until_ready(lstm_classifier_forward(sentence, params))
    assert out.shape == (B, target_size)
    assert bool(jnp.all(jnp.isfinite(out)))
    assert bool(jnp.allclose(out, ref, atol=2e-4, rtol=2e-4))

    # Exercise the time-chunked grid (h/c carried across grid steps) ...
    out4 = jax.block_until_ready(
        lstm_classifier_forward(sentence, params, time_chunk=4))
    assert bool(jnp.allclose(out4, ref, atol=2e-4, rtol=2e-4))
    # ... and the non-divisible-T masked path.
    out3 = jax.block_until_ready(
        lstm_classifier_forward(sentence, params, time_chunk=3))
    assert bool(jnp.allclose(out3, ref, atol=2e-4, rtol=2e-4))

    print("KERNEL_OK")
</pallas_src>

<mosaic_0001>
module attributes {stable_mosaic.version = 11 : i64} {
  func.func @lstm_clf_kernel(%arg0: i32, %arg1: memref<64x64xf32, #tpu.memory_space<vmem>>, %arg2: memref<64x128xf32, #tpu.memory_space<vmem>>, %arg3: memref<16x128xf32, #tpu.memory_space<vmem>>, %arg4: memref<1x128xf32, #tpu.memory_space<vmem>>, %arg5: memref<64x128xf32, #tpu.memory_space<vmem>>, %arg6: memref<1x128xf32, #tpu.memory_space<vmem>>, %arg7: memref<32x128xf32, #tpu.memory_space<vmem>>, %arg8: memref<1x128xf32, #tpu.memory_space<vmem>>, %arg9: memref<8x128xf32, #tpu.memory_space<vmem>>, %arg10: memref<64x128xf32, #tpu.memory_space<vmem>>, %arg11: memref<8x16xf32, #tpu.memory_space<vmem>>, %arg12: memref<8x16xf32, #tpu.memory_space<vmem>>) attributes {dimension_semantics = [#tpu.dimension_semantics<arbitrary>], iteration_bounds = array<i64: 1>, scalar_prefetch = 0 : i64, scratch_operands = 3 : i64, tpu.core_type = #tpu.core_type<tc>, window_params = [{transform_indices = @transform_0, window_bounds = array<i64: 64, 64>}, {pipeline_mode = #tpu.pipeline_mode<synchronous>, transform_indices = @transform_1, window_bounds = array<i64: 64, 128>}, {pipeline_mode = #tpu.pipeline_mode<synchronous>, transform_indices = @transform_2, window_bounds = array<i64: 16, 128>}, {pipeline_mode = #tpu.pipeline_mode<synchronous>, transform_indices = @transform_3, window_bounds = array<i64: 1, 128>}, {pipeline_mode = #tpu.pipeline_mode<synchronous>, transform_indices = @transform_4, window_bounds = array<i64: 64, 128>}, {pipeline_mode = #tpu.pipeline_mode<synchronous>, transform_indices = @transform_5, window_bounds = array<i64: 1, 128>}, {pipeline_mode = #tpu.pipeline_mode<synchronous>, transform_indices = @transform_6, window_bounds = array<i64: 32, 128>}, {pipeline_mode = #tpu.pipeline_mode<synchronous>, transform_indices = @transform_7, window_bounds = array<i64: 1, 128>}, {pipeline_mode = #tpu.pipeline_mode<synchronous>, transform_indices = @transform_8, window_bounds = array<i64: 8, 128>}]} {
    %c0_i32 = arith.constant 0 : i32
    %0 = arith.cmpi eq, %arg0, %c0_i32 : i32
    %1 = arith.extui %0 : i1 to i32
    %c0_i32_0 = arith.constant 0 : i32
    %2 = arith.cmpi ne, %1, %c0_i32_0 : i32
    scf.if %2 {
      %cst_131 = arith.constant 0.000000e+00 : f32
      %321 = vector.broadcast %cst_131 : f32 to vector<8x16xf32>
      %c0_132 = arith.constant 0 : index
      %c0_133 = arith.constant 0 : index
      %322 = vector.load %arg11[%c0_132, %c0_133] : memref<8x16xf32, #tpu.memory_space<vmem>>, vector<8x16xf32>
      tpu.vector_store %arg11[%c0_132, %c0_133], %321 {strides = array<i32>} : memref<8x16xf32, #tpu.memory_space<vmem>>, vector<8x16xf32>,
      %cst_134 = arith.constant 0.000000e+00 : f32
      %323 = vector.broadcast %cst_134 : f32 to vector<8x16xf32>
      %c0_135 = arith.constant 0 : index
      %c0_136 = arith.constant 0 : index
      %324 = vector.load %arg12[%c0_135, %c0_136] : memref<8x16xf32, #tpu.memory_space<vmem>>, vector<8x16xf32>
      tpu.vector_store %arg12[%c0_135, %c0_136], %323 {strides = array<i32>} : memref<8x16xf32, #tpu.memory_space<vmem>>, vector<8x16xf32>,
    } else {
    }
    %c0 = arith.constant 0 : index
    %c0_1 = arith.constant 0 : index
    %3 = vector.load %arg1[%c0, %c0_1] : memref<64x64xf32, #tpu.memory_space<vmem>>, vector<64x64xf32>
    %c0_2 = arith.constant 0 : index
    %c0_3 = arith.constant 0 : index
    %4 = vector.load %arg2[%c0_2, %c0_3] : memref<64x128xf32, #tpu.memory_space<vmem>>, vector<64x128xf32>
    %cst = arith.constant dense<0.000000e+00> : vector<64x128xf32>
    %5 = tpu.matmul %3, %4, %cst {dimension_numbers = #tpu.dot_dimension_numbers<[1], [0], [0], [1], [0, 0, 1, 1], [], []>} : vector<64x64xf32>, vector<64x128xf32>, vector<64x128xf32> -> vector<64x128xf32>
    %c0_4 = arith.constant 0 : index
    %c0_5 = arith.constant 0 : index
    %6 = vector.load %arg4[%c0_4, %c0_5] : memref<1x128xf32, #tpu.memory_space<vmem>>, vector<1x128xf32>
    %7 = vector.broadcast %6 : vector<1x128xf32> to vector<64x128xf32>
    %8 = arith.addf %5, %7 : vector<64x128xf32>
    %c0_6 = arith.constant 0 : index
    %c0_7 = arith.constant 0 : index
    %9 = vector.load %arg10[%c0_6, %c0_7] : memref<64x128xf32, #tpu.memory_space<vmem>>, vector<64x128xf32>
    tpu.vector_store %arg10[%c0_6, %c0_7], %8 {strides = array<i32>} : memref<64x128xf32, #tpu.memory_space<vmem>>, vector<64x128xf32>,
    %c0_8 = arith.constant 0 : index
    %c0_9 = arith.constant 0 : index
    %10 = vector.load %arg11[%c0_8, %c0_9] : memref<8x16xf32, #tpu.memory_space<vmem>>, vector<8x16xf32>
    %c0_10 = arith.constant 0 : index
    %c0_11 = arith.constant 0 : index
    %11 = vector.load %arg12[%c0_10, %c0_11] : memref<8x16xf32, #tpu.memory_space<vmem>>, vector<8x16xf32>
    %c0_i32_12 = arith.constant 0 : i32
    %c8_i32 = arith.constant 8 : i32
    %12 = arith.muli %c0_i32_12, %c8_i32 : i32
    %13 = tpu.assume_multiple %12, 8 : i32
    %14 = arith.index_cast %13 : i32 to index
    %c0_13 = arith.constant 0 : index
    %15 = vector.load %arg10[%14, %c0_13] : memref<64x128xf32, #tpu.memory_space<vmem>>, vector<8x128xf32>
    %c0_14 = arith.constant 0 : index
    %c0_15 = arith.constant 0 : index
    %16 = vector.load %arg3[%c0_14, %c0_15] : memref<16x128xf32, #tpu.memory_space<vmem>>, vector<16x128xf32>
    %cst_16 = arith.constant dense<0.000000e+00> : vector<8x128xf32>
    %17 = tpu.matmul %10, %16, %cst_16 {dimension_numbers = #tpu.dot_dimension_numbers<[1], [0], [0], [1], [0, 0, 1, 1], [], []>} : vector<8x16xf32>, vector<16x128xf32>, vector<8x128xf32> -> vector<8x128xf32>
    %18 = arith.addf %15, %17 : vector<8x128xf32>
    %19 = vector.extract_strided_slice %18 {offsets = [0, 0], sizes = [8, 16], strides = [1, 1]} : vector<8x128xf32> to vector<8x16xf32>
    %cst_17 = arith.constant 5.000000e-01 : f32
    %20 = vector.broadcast %cst_17 : f32 to vector<8x16xf32>
    %21 = arith.mulf %20, %19 : vector<8x16xf32>
    %22 = math.tanh %21 : vector<8x16xf32>
    %cst_18 = arith.constant 5.000000e-01 : f32
    %23 = vector.broadcast %cst_18 : f32 to vector<8x16xf32>
    %24 = arith.mulf %23, %22 : vector<8x16xf32>
    %cst_19 = arith.constant 5.000000e-01 : f32
    %25 = vector.broadcast %cst_19 : f32 to vector<8x16xf32>
    %26 = arith.addf %24, %25 : vector<8x16xf32>
    %27 = vector.extract_strided_slice %18 {offsets = [0, 16], sizes = [8, 16], strides = [1, 1]} : vector<8x128xf32> to vector<8x16xf32>
    %cst_20 = arith.constant 5.000000e-01 : f32
    %28 = vector.broadcast %cst_20 : f32 to vector<8x16xf32>
    %29 = arith.mulf %28, %27 : vector<8x16xf32>
    %30 = math.tanh %29 : vector<8x16xf32>
    %cst_21 = arith.constant 5.000000e-01 : f32
    %31 = vector.broadcast %cst_21 : f32 to vector<8x16xf32>
    %32 = arith.mulf %31, %30 : vector<8x16xf32>
    %cst_22 = arith.constant 5.000000e-01 : f32
    %33 = vector.broadcast %cst_22 : f32 to vector<8x16xf32>
    %34 = arith.addf %32, %33 : vector<8x16xf32>
    %35 = vector.extract_strided_slice %18 {offsets = [0, 32], sizes = [8, 16], strides = [1, 1]} : vector<8x128xf32> to vector<8x16xf32>
    %36 = math.tanh %35 : vector<8x16xf32>
    %37 = vector.extract_strided_slice %18 {offsets = [0, 48], sizes = [8, 16], strides = [1, 1]} : vector<8x128xf32> to vector<8x16xf32>
    %cst_23 = arith.constant 5.000000e-01 : f32
    %38 = vector.broadcast %cst_23 : f32 to vector<8x16xf32>
    %39 = arith.mulf %38, %37 : vector<8x16xf32>
    %40 = math.tanh %39 : vector<8x16xf32>
    %cst_24 = arith.constant 5.000000e-01 : f32
    %41 = vector.broadcast %cst_24 : f32 to vector<8x16xf32>
    %42 = arith.mulf %41, %40 : vector<8x16xf32>
    %cst_25 = arith.constant 5.000000e-01 : f32
    %43 = vector.broadcast %cst_25 : f32 to vector<8x16xf32>
    %44 = arith.addf %42, %43 : vector<8x16xf32>
    %45 = arith.mulf %34, %11 : vector<8x16xf32>
    %46 = arith.mulf %26, %36 : vector<8x16xf32>
    %47 = arith.addf %45, %46 : vector<8x16xf32>
    %48 = math.tanh %47 : vector<8x16xf32>
    %49 = arith.mulf %44, %48 : vector<8x16xf32>
    %c1_i32 = arith.constant 1 : i32
    %c8_i32_26 = arith.constant 8 : i32
    %50 = arith.muli %c1_i32, %c8_i32_26 : i32
    %51 = tpu.assume_multiple %50, 8 : i32
    %52 = arith.index_cast %51 : i32 to index
    %c0_27 = arith.constant 0 : index
    %53 = vector.load %arg10[%52, %c0_27] : memref<64x128xf32, #tpu.memory_space<vmem>>, vector<8x128xf32>
    %c0_28 = arith.constant 0 : index
    %c0_29 = arith.constant 0 : index
    %54 = vector.load %arg3[%c0_28, %c0_29] : memref<16x128xf32, #tpu.memory_space<vmem>>, vector<16x128xf32>
    %cst_30 = arith.constant dense<0.000000e+00> : vector<8x128xf32>
    %55 = tpu.matmul %49, %54, %cst_30 {dimension_numbers = #tpu.dot_dimension_numbers<[1], [0], [0], [1], [0, 0, 1, 1], [], []>} : vector<8x16xf32>, vector<16x128xf32>, vector<8x128xf32> -> vector<8x128xf32>
    %56 = arith.addf %53, %55 : vector<8x128xf32>
    %57 = vector.extract_strided_slice %56 {offsets = [0, 0], sizes = [8, 16], strides = [1, 1]} : vector<8x128xf32> to vector<8x16xf32>
    %cst_31 = arith.constant 5.000000e-01 : f32
    %58 = vector.broadcast %cst_31 : f32 to vector<8x16xf32>
    %59 = arith.mulf %58, %57 : vector<8x16xf32>
    %60 = math.tanh %59 : vector<8x16xf32>
    %cst_32 = arith.constant 5.000000e-01 : f32
    %61 = vector.broadcast %cst_32 : f32 to vector<8x16xf32>
    %62 = arith.mulf %61, %60 : vector<8x16xf32>
    %cst_33 = arith.constant 5.000000e-01 : f32
    %63 = vector.broadcast %cst_33 : f32 to vector<8x16xf32>
    %64 = arith.addf %62, %63 : vector<8x16xf32>
    %65 = vector.extract_strided_slice %56 {offsets = [0, 16], sizes = [8, 16], strides = [1, 1]} : vector<8x128xf32> to vector<8x16xf32>
    %cst_34 = arith.constant 5.000000e-01 : f32
    %66 = vector.broadcast %cst_34 : f32 to vector<8x16xf32>
    %67 = arith.mulf %66, %65 : vector<8x16xf32>
    %68 = math.tanh %67 : vector<8x16xf32>
    %cst_35 = arith.constant 5.000000e-01 : f32
    %69 = vector.broadcast %cst_35 : f32 to vector<8x16xf32>
    %70 = arith.mulf %69, %68 : vector<8x16xf32>
    %cst_36 = arith.constant 5.000000e-01 : f32
    %71 = vector.broadcast %cst_36 : f32 to vector<8x16xf32>
    %72 = arith.addf %70, %71 : vector<8x16xf32>
    %73 = vector.extract_strided_slice %56 {offsets = [0, 32], sizes = [8, 16], strides = [1, 1]} : vector<8x128xf32> to vector<8x16xf32>
    %74 = math.tanh %73 : vector<8x16xf32>
    %75 = vector.extract_strided_slice %56 {offsets = [0, 48], sizes = [8, 16], strides = [1, 1]} : vector<8x128xf32> to vector<8x16xf32>
    %cst_37 = arith.constant 5.000000e-01 : f32
    %76 = vector.broadcast %cst_37 : f32 to vector<8x16xf32>
    %77 = arith.mulf %76, %75 : vector<8x16xf32>
    %78 = math.tanh %77 : vector<8x16xf32>
    %cst_38 = arith.constant 5.000000e-01 : f32
    %79 = vector.broadcast %cst_38 : f32 to vector<8x16xf32>
    %80 = arith.mulf %79, %78 : vector<8x16xf32>
    %cst_39 = arith.constant 5.000000e-01 : f32
    %81 = vector.broadcast %cst_39 : f32 to vector<8x16xf32>
    %82 = arith.addf %80, %81 : vector<8x16xf32>
    %83 = arith.mulf %72, %47 : vector<8x16xf32>
    %84 = arith.mulf %64, %74 : vector<8x16xf32>
    %85 = arith.addf %83, %84 : vector<8x16xf32>
    %86 = math.tanh %85 : vector<8x16xf32>
    %87 = arith.mulf %82, %86 : vector<8x16xf32>
    %c2_i32 = arith.constant 2 : i32
    %c8_i32_40 = arith.constant 8 : i32
    %88 = arith.muli %c2_i32, %c8_i32_40 : i32
    %89 = tpu.assume_multiple %88, 8 : i32
    %90 = arith.index_cast %89 : i32 to index
    %c0_41 = arith.constant 0 : index
    %91 = vector.load %arg10[%90, %c0_41] : memref<64x128xf32, #tpu.memory_space<vmem>>, vector<8x128xf32>
    %c0_42 = arith.constant 0 : index
    %c0_43 = arith.constant 0 : index
    %92 = vector.load %arg3[%c0_42, %c0_43] : memref<16x128xf32, #tpu.memory_space<vmem>>, vector<16x128xf32>
    %cst_44 = arith.constant dense<0.000000e+00> : vector<8x128xf32>
    %93 = tpu.matmul %87, %92, %cst_44 {dimension_numbers = #tpu.dot_dimension_numbers<[1], [0], [0], [1], [0, 0, 1, 1], [], []>} : vector<8x16xf32>, vector<16x128xf32>, vector<8x128xf32> -> vector<8x128xf32>
    %94 = arith.addf %91, %93 : vector<8x128xf32>
    %95 = vector.extract_strided_slice %94 {offsets = [0, 0], sizes = [8, 16], strides = [1, 1]} : vector<8x128xf32> to vector<8x16xf32>
    %cst_45 = arith.constant 5.000000e-01 : f32
    %96 = vector.broadcast %cst_45 : f32 to vector<8x16xf32>
    %97 = arith.mulf %96, %95 : vector<8x16xf32>
    %98 = math.tanh %97 : vector<8x16xf32>
    %cst_46 = arith.constant 5.000000e-01 : f32
    %99 = vector.broadcast %cst_46 : f32 to vector<8x16xf32>
    %100 = arith.mulf %99, %98 : vector<8x16xf32>
    %cst_47 = arith.constant 5.000000e-01 : f32
    %101 = vector.broadcast %cst_47 : f32 to vector<8x16xf32>
    %102 = arith.addf %100, %101 : vector<8x16xf32>
    %103 = vector.extract_strided_slice %94 {offsets = [0, 16], sizes = [8, 16], strides = [1, 1]} : vector<8x128xf32> to vector<8x16xf32>
    %cst_48 = arith.constant 5.000000e-01 : f32
    %104 = vector.broadcast %cst_48 : f32 to vector<8x16xf32>
    %105 = arith.mulf %104, %103 : vector<8x16xf32>
    %106 = math.tanh %105 : vector<8x16xf32>
    %cst_49 = arith.constant 5.000000e-01 : f32
    %107 = vector.broadcast %cst_49 : f32 to vector<8x16xf32>
    %108 = arith.mulf %107, %106 : vector<8x16xf32>
    %cst_50 = arith.constant 5.000000e-01 : f32
    %109 = vector.broadcast %cst_50 : f32 to vector<8x16xf32>
    %110 = arith.addf %108, %109 : vector<8x16xf32>
    %111 = vector.extract_strided_slice %94 {offsets = [0, 32], sizes = [8, 16], strides = [1, 1]} : vector<8x128xf32> to vector<8x16xf32>
    %112 = math.tanh %111 : vector<8x16xf32>
    %113 = vector.extract_strided_slice %94 {offsets = [0, 48], sizes = [8, 16], strides = [1, 1]} : vector<8x128xf32> to vector<8x16xf32>
    %cst_51 = arith.constant 5.000000e-01 : f32
    %114 = vector.broadcast %cst_51 : f32 to vector<8x16xf32>
    %115 = arith.mulf %114, %113 : vector<8x16xf32>
    %116 = math.tanh %115 : vector<8x16xf32>
    %cst_52 = arith.constant 5.000000e-01 : f32
    %117 = vector.broadcast %cst_52 : f32 to vector<8x16xf32>
    %118 = arith.mulf %117, %116 : vector<8x16xf32>
    %cst_53 = arith.constant 5.000000e-01 : f32
    %119 = vector.broadcast %cst_53 : f32 to vector<8x16xf32>
    %120 = arith.addf %118, %119 : vector<8x16xf32>
    %121 = arith.mulf %110, %85 : vector<8x16xf32>
    %122 = arith.mulf %102, %112 : vector<8x16xf32>
    %123 = arith.addf %121, %122 : vector<8x16xf32>
    %124 = math.tanh %123 : vector<8x16xf32>
    %125 = arith.mulf %120, %124 : vector<8x16xf32>
    %c3_i32 = arith.constant 3 : i32
    %c8_i32_54 = arith.constant 8 : i32
    %126 = arith.muli %c3_i32, %c8_i32_54 : i32
    %127 = tpu.assume_multiple %126, 8 : i32
    %128 = arith.index_cast %127 : i32 to index
    %c0_55 = arith.constant 0 : index
    %129 = vector.load %arg10[%128, %c0_55] : memref<64x128xf32, #tpu.memory_space<vmem>>, vector<8x128xf32>
    %c0_56 = arith.constant 0 : index
    %c0_57 = arith.constant 0 : index
    %130 = vector.load %arg3[%c0_56, %c0_57] : memref<16x128xf32, #tpu.memory_space<vmem>>, vector<16x128xf32>
    %cst_58 = arith.constant dense<0.000000e+00> : vector<8x128xf32>
    %131 = tpu.matmul %125, %130, %cst_58 {dimension_numbers = #tpu.dot_dimension_numbers<[1], [0], [0], [1], [0, 0, 1, 1], [], []>} : vector<8x16xf32>, vector<16x128xf32>, vector<8x128xf32> -> vector<8x128xf32>
    %132 = arith.addf %129, %131 : vector<8x128xf32>
    %133 = vector.extract_strided_slice %132 {offsets = [0, 0], sizes = [8, 16], strides = [1, 1]} : vector<8x128xf32> to vector<8x16xf32>
    %cst_59 = arith.constant 5.000000e-01 : f32
    %134 = vector.broadcast %cst_59 : f32 to vector<8x16xf32>
    %135 = arith.mulf %134, %133 : vector<8x16xf32>
    %136 = math.tanh %135 : vector<8x16xf32>
    %cst_60 = arith.constant 5.000000e-01 : f32
    %137 = vector.broadcast %cst_60 : f32 to vector<8x16xf32>
    %138 = arith.mulf %137, %136 : vector<8x16xf32>
    %cst_61 = arith.constant 5.000000e-01 : f32
    %139 = vector.broadcast %cst_61 : f32 to vector<8x16xf32>
    %140 = arith.addf %138, %139 : vector<8x16xf32>
    %141 = vector.extract_strided_slice %132 {offsets = [0, 16], sizes = [8, 16], strides = [1, 1]} : vector<8x128xf32> to vector<8x16xf32>
    %cst_62 = arith.constant 5.000000e-01 : f32
    %142 = vector.broadcast %cst_62 : f32 to vector<8x16xf32>
    %143 = arith.mulf %142, %141 : vector<8x16xf32>
    %144 = math.tanh %143 : vector<8x16xf32>
    %cst_63 = arith.constant 5.000000e-01 : f32
    %145 = vector.broadcast %cst_63 : f32 to vector<8x16xf32>
    %146 = arith.mulf %145, %144 : vector<8x16xf32>
    %cst_64 = arith.constant 5.000000e-01 : f32
    %147 = vector.broadcast %cst_64 : f32 to vector<8x16xf32>
    %148 = arith.addf %146, %147 : vector<8x16xf32>
    %149 = vector.extract_strided_slice %132 {offsets = [0, 32], sizes = [8, 16], strides = [1, 1]} : vector<8x128xf32> to vector<8x16xf32>
    %150 = math.tanh %149 : vector<8x16xf32>
    %151 = vector.extract_strided_slice %132 {offsets = [0, 48], sizes = [8, 16], strides = [1, 1]} : vector<8x128xf32> to vector<8x16xf32>
    %cst_65 = arith.constant 5.000000e-01 : f32
    %152 = vector.broadcast %cst_65 : f32 to vector<8x16xf32>
    %153 = arith.mulf %152, %151 : vector<8x16xf32>
    %154 = math.tanh %153 : vector<8x16xf32>
    %cst_66 = arith.constant 5.000000e-01 : f32
    %155 = vector.broadcast %cst_66 : f32 to vector<8x16xf32>
    %156 = arith.mulf %155, %154 : vector<8x16xf32>
    %cst_67 = arith.constant 5.000000e-01 : f32
    %157 = vector.broadcast %cst_67 : f32 to vector<8x16xf32>
    %158 = arith.addf %156, %157 : vector<8x16xf32>
    %159 = arith.mulf %148, %123 : vector<8x16xf32>
    %160 = arith.mulf %140, %150 : vector<8x16xf32>
    %161 = arith.addf %159, %160 : vector<8x16xf32>
    %162 = math.tanh %161 : vector<8x16xf32>
    %163 = arith.mulf %158, %162 : vector<8x16xf32>
    %c4_i32 = arith.constant 4 : i32
    %c8_i32_68 = arith.constant 8 : i32
    %164 = arith.muli %c4_i32, %c8_i32_68 : i32
    %165 = tpu.assume_multiple %164, 8 : i32
    %166 = arith.index_cast %165 : i32 to index
    %c0_69 = arith.constant 0 : index
    %167 = vector.load %arg10[%166, %c0_69] : memref<64x128xf32, #tpu.memory_space<vmem>>, vector<8x128xf32>
    %c0_70 = arith.constant 0 : index
    %c0_71 = arith.constant 0 : index
    %168 = vector.load %arg3[%c0_70, %c0_71] : memref<16x128xf32, #tpu.memory_space<vmem>>, vector<16x128xf32>
    %cst_72 = arith.constant dense<0.000000e+00> : vector<8x128xf32>
    %169 = tpu.matmul %163, %168, %cst_72 {dimension_numbers = #tpu.dot_dimension_numbers<[1], [0], [0], [1], [0, 0, 1, 1], [], []>} : vector<8x16xf32>, vector<16x128xf32>, vector<8x128xf32> -> vector<8x128xf32>
    %170 = arith.addf %167, %169 : vector<8x128xf32>
    %171 = vector.extract_strided_slice %170 {offsets = [0, 0], sizes = [8, 16], strides = [1, 1]} : vector<8x128xf32> to vector<8x16xf32>
    %cst_73 = arith.constant 5.000000e-01 : f32
    %172 = vector.broadcast %cst_73 : f32 to vector<8x16xf32>
    %173 = arith.mulf %172, %171 : vector<8x16xf32>
    %174 = math.tanh %173 : vector<8x16xf32>
    %cst_74 = arith.constant 5.000000e-01 : f32
    %175 = vector.broadcast %cst_74 : f32 to vector<8x16xf32>
    %176 = arith.mulf %175, %174 : vector<8x16xf32>
    %cst_75 = arith.constant 5.000000e-01 : f32
    %177 = vector.broadcast %cst_75 : f32 to vector<8x16xf32>
    %178 = arith.addf %176, %177 : vector<8x16xf32>
    %179 = vector.extract_strided_slice %170 {offsets = [0, 16], sizes = [8, 16], strides = [1, 1]} : vector<8x128xf32> to vector<8x16xf32>
    %cst_76 = arith.constant 5.000000e-01 : f32
    %180 = vector.broadcast %cst_76 : f32 to vector<8x16xf32>
    %181 = arith.mulf %180, %179 : vector<8x16xf32>
    %182 = math.tanh %181 : vector<8x16xf32>
    %cst_77 = arith.constant 5.000000e-01 : f32
    %183 = vector.broadcast %cst_77 : f32 to vector<8x16xf32>
    %184 = arith.mulf %183, %182 : vector<8x16xf32>
    %cst_78 = arith.constant 5.000000e-01 : f32
    %185 = vector.broadcast %cst_78 : f32 to vector<8x16xf32>
    %186 = arith.addf %184, %185 : vector<8x16xf32>
    %187 = vector.extract_strided_slice %170 {offsets = [0, 32], sizes = [8, 16], strides = [1, 1]} : vector<8x128xf32> to vector<8x16xf32>
    %188 = math.tanh %187 : vector<8x16xf32>
    %189 = vector.extract_strided_slice %170 {offsets = [0, 48], sizes = [8, 16], strides = [1, 1]} : vector<8x128xf32> to vector<8x16xf32>
    %cst_79 = arith.constant 5.000000e-01 : f32
    %190 = vector.broadcast %cst_79 : f32 to vector<8x16xf32>
    %191 = arith.mulf %190, %189 : vector<8x16xf32>
    %192 = math.tanh %191 : vector<8x16xf32>
    %cst_80 = arith.constant 5.000000e-01 : f32
    %193 = vector.broadcast %cst_80 : f32 to vector<8x16xf32>
    %194 = arith.mulf %193, %192 : vector<8x16xf32>
    %cst_81 = arith.constant 5.000000e-01 : f32
    %195 = vector.broadcast %cst_81 : f32 to vector<8x16xf32>
    %196 = arith.addf %194, %195 : vector<8x16xf32>
    %197 = arith.mulf %186, %161 : vector<8x16xf32>
    %198 = arith.mulf %178, %188 : vector<8x16xf32>
    %199 = arith.addf %197, %198 : vector<8x16xf32>
    %200 = math.tanh %199 : vector<8x16xf32>
    %201 = arith.mulf %196, %200 : vector<8x16xf32>
    %c5_i32 = arith.constant 5 : i32
    %c8_i32_82 = arith.constant 8 : i32
    %202 = arith.muli %c5_i32, %c8_i32_82 : i32
    %203 = tpu.assume_multiple %202, 8 : i32
    %204 = arith.index_cast %203 : i32 to index
    %c0_83 = arith.constant 0 : index
    %205 = vector.load %arg10[%204, %c0_83] : memref<64x128xf32, #tpu.memory_space<vmem>>, vector<8x128xf32>
    %c0_84 = arith.constant 0 : index
    %c0_85 = arith.constant 0 : index
    %206 = vector.load %arg3[%c0_84, %c0_85] : memref<16x128xf32, #tpu.memory_space<vmem>>, vector<16x128xf32>
    %cst_86 = arith.constant dense<0.000000e+00> : vector<8x128xf32>
    %207 = tpu.matmul %201, %206, %cst_86 {dimension_numbers = #tpu.dot_dimension_numbers<[1], [0], [0], [1], [0, 0, 1, 1], [], []>} : vector<8x16xf32>, vector<16x128xf32>, vector<8x128xf32> -> vector<8x128xf32>
    %208 = arith.addf %205, %207 : vector<8x128xf32>
    %209 = vector.extract_strided_slice %208 {offsets = [0, 0], sizes = [8, 16], strides = [1, 1]} : vector<8x128xf32> to vector<8x16xf32>
    %cst_87 = arith.constant 5.000000e-01 : f32
    %210 = vector.broadcast %cst_87 : f32 to vector<8x16xf32>
    %211 = arith.mulf %210, %209 : vector<8x16xf32>
    %212 = math.tanh %211 : vector<8x16xf32>
    %cst_88 = arith.constant 5.000000e-01 : f32
    %213 = vector.broadcast %cst_88 : f32 to vector<8x16xf32>
    %214 = arith.mulf %213, %212 : vector<8x16xf32>
    %cst_89 = arith.constant 5.000000e-01 : f32
    %215 = vector.broadcast %cst_89 : f32 to vector<8x16xf32>
    %216 = arith.addf %214, %215 : vector<8x16xf32>
    %217 = vector.extract_strided_slice %208 {offsets = [0, 16], sizes = [8, 16], strides = [1, 1]} : vector<8x128xf32> to vector<8x16xf32>
    %cst_90 = arith.constant 5.000000e-01 : f32
    %218 = vector.broadcast %cst_90 : f32 to vector<8x16xf32>
    %219 = arith.mulf %218, %217 : vector<8x16xf32>
    %220 = math.tanh %219 : vector<8x16xf32>
    %cst_91 = arith.constant 5.000000e-01 : f32
    %221 = vector.broadcast %cst_91 : f32 to vector<8x16xf32>
    %222 = arith.mulf %221, %220 : vector<8x16xf32>
    %cst_92 = arith.constant 5.000000e-01 : f32
    %223 = vector.broadcast %cst_92 : f32 to vector<8x16xf32>
    %224 = arith.addf %222, %223 : vector<8x16xf32>
    %225 = vector.extract_strided_slice %208 {offsets = [0, 32], sizes = [8, 16], strides = [1, 1]} : vector<8x128xf32> to vector<8x16xf32>
    %226 = math.tanh %225 : vector<8x16xf32>
    %227 = vector.extract_strided_slice %208 {offsets = [0, 48], sizes = [8, 16], strides = [1, 1]} : vector<8x128xf32> to vector<8x16xf32>
    %cst_93 = arith.constant 5.000000e-01 : f32
    %228 = vector.broadcast %cst_93 : f32 to vector<8x16xf32>
    %229 = arith.mulf %228, %227 : vector<8x16xf32>
    %230 = math.tanh %229 : vector<8x16xf32>
    %cst_94 = arith.constant 5.000000e-01 : f32
    %231 = vector.broadcast %cst_94 : f32 to vector<8x16xf32>
    %232 = arith.mulf %231, %230 : vector<8x16xf32>
    %cst_95 = arith.constant 5.000000e-01 : f32
    %233 = vector.broadcast %cst_95 : f32 to vector<8x16xf32>
    %234 = arith.addf %232, %233 : vector<8x16xf32>
    %235 = arith.mulf %224, %199 : vector<8x16xf32>
    %236 = arith.mulf %216, %226 : vector<8x16xf32>
    %237 = arith.addf %235, %236 : vector<8x16xf32>
    %238 = math.tanh %237 : vector<8x16xf32>
    %239 = arith.mulf %234, %238 : vector<8x16xf32>
    %c6_i32 = arith.constant 6 : i32
    %c8_i32_96 = arith.constant 8 : i32
    %240 = arith.muli %c6_i32, %c8_i32_96 : i32
    %241 = tpu.assume_multiple %240, 8 : i32
    %242 = arith.index_cast %241 : i32 to index
    %c0_97 = arith.constant 0 : index
    %243 = vector.load %arg10[%242, %c0_97] : memref<64x128xf32, #tpu.memory_space<vmem>>, vector<8x128xf32>
    %c0_98 = arith.constant 0 : index
    %c0_99 = arith.constant 0 : index
    %244 = vector.load %arg3[%c0_98, %c0_99] : memref<16x128xf32, #tpu.memory_space<vmem>>, vector<16x128xf32>
    %cst_100 = arith.constant dense<0.000000e+00> : vector<8x128xf32>
    %245 = tpu.matmul %239, %244, %cst_100 {dimension_numbers = #tpu.dot_dimension_numbers<[1], [0], [0], [1], [0, 0, 1, 1], [], []>} : vector<8x16xf32>, vector<16x128xf32>, vector<8x128xf32> -> vector<8x128xf32>
    %246 = arith.addf %243, %245 : vector<8x128xf32>
    %247 = vector.extract_strided_slice %246 {offsets = [0, 0], sizes = [8, 16], strides = [1, 1]} : vector<8x128xf32> to vector<8x16xf32>
    %cst_101 = arith.constant 5.000000e-01 : f32
    %248 = vector.broadcast %cst_101 : f32 to vector<8x16xf32>
    %249 = arith.mulf %248, %247 : vector<8x16xf32>
    %250 = math.tanh %249 : vector<8x16xf32>
    %cst_102 = arith.constant 5.000000e-01 : f32
    %251 = vector.broadcast %cst_102 : f32 to vector<8x16xf32>
    %252 = arith.mulf %251, %250 : vector<8x16xf32>
    %cst_103 = arith.constant 5.000000e-01 : f32
    %253 = vector.broadcast %cst_103 : f32 to vector<8x16xf32>
    %254 = arith.addf %252, %253 : vector<8x16xf32>
    %255 = vector.extract_strided_slice %246 {offsets = [0, 16], sizes = [8, 16], strides = [1, 1]} : vector<8x128xf32> to vector<8x16xf32>
    %cst_104 = arith.constant 5.000000e-01 : f32
    %256 = vector.broadcast %cst_104 : f32 to vector<8x16xf32>
    %257 = arith.mulf %256, %255 : vector<8x16xf32>
    %258 = math.tanh %257 : vector<8x16xf32>
    %cst_105 = arith.constant 5.000000e-01 : f32
    %259 = vector.broadcast %cst_105 : f32 to vector<8x16xf32>
    %260 = arith.mulf %259, %258 : vector<8x16xf32>
    %cst_106 = arith.constant 5.000000e-01 : f32
    %261 = vector.broadcast %cst_106 : f32 to vector<8x16xf32>
    %262 = arith.addf %260, %261 : vector<8x16xf32>
    %263 = vector.extract_strided_slice %246 {offsets = [0, 32], sizes = [8, 16], strides = [1, 1]} : vector<8x128xf32> to vector<8x16xf32>
    %264 = math.tanh %263 : vector<8x16xf32>
    %265 = vector.extract_strided_slice %246 {offsets = [0, 48], sizes = [8, 16], strides = [1, 1]} : vector<8x128xf32> to vector<8x16xf32>
    %cst_107 = arith.constant 5.000000e-01 : f32
    %266 = vector.broadcast %cst_107 : f32 to vector<8x16xf32>
    %267 = arith.mulf %266, %265 : vector<8x16xf32>
    %268 = math.tanh %267 : vector<8x16xf32>
    %cst_108 = arith.constant 5.000000e-01 : f32
    %269 = vector.broadcast %cst_108 : f32 to vector<8x16xf32>
    %270 = arith.mulf %269, %268 : vector<8x16xf32>
    %cst_109 = arith.constant 5.000000e-01 : f32
    %271 = vector.broadcast %cst_109 : f32 to vector<8x16xf32>
    %272 = arith.addf %270, %271 : vector<8x16xf32>
    %273 = arith.mulf %262, %237 : vector<8x16xf32>
    %274 = arith.mulf %254, %264 : vector<8x16xf32>
    %275 = arith.addf %273, %274 : vector<8x16xf32>
    %276 = math.tanh %275 : vector<8x16xf32>
    %277 = arith.mulf %272, %276 : vector<8x16xf32>
    %c7_i32 = arith.constant 7 : i32
    %c8_i32_110 = arith.constant 8 : i32
    %278 = arith.muli %c7_i32, %c8_i32_110 : i32
    %279 = tpu.assume_multiple %278, 8 : i32
    %280 = arith.index_cast %279 : i32 to index
    %c0_111 = arith.constant 0 : index
    %281 = vector.load %arg10[%280, %c0_111] : memref<64x128xf32, #tpu.memory_space<vmem>>, vector<8x128xf32>
    %c0_112 = arith.constant 0 : index
    %c0_113 = arith.constant 0 : index
    %282 = vector.load %arg3[%c0_112, %c0_113] : memref<16x128xf32, #tpu.memory_space<vmem>>, vector<16x128xf32>
    %cst_114 = arith.constant dense<0.000000e+00> : vector<8x128xf32>
    %283 = tpu.matmul %277, %282, %cst_114 {dimension_numbers = #tpu.dot_dimension_numbers<[1], [0], [0], [1], [0, 0, 1, 1], [], []>} : vector<8x16xf32>, vector<16x128xf32>, vector<8x128xf32> -> vector<8x128xf32>
    %284 = arith.addf %281, %283 : vector<8x128xf32>
    %285 = vector.extract_strided_slice %284 {offsets = [0, 0], sizes = [8, 16], strides = [1, 1]} : vector<8x128xf32> to vector<8x16xf32>
    %cst_115 = arith.constant 5.000000e-01 : f32
    %286 = vector.broadcast %cst_115 : f32 to vector<8x16xf32>
    %287 = arith.mulf %286, %285 : vector<8x16xf32>
    %288 = math.tanh %287 : vector<8x16xf32>
    %cst_116 = arith.constant 5.000000e-01 : f32
    %289 = vector.broadcast %cst_116 : f32 to vector<8x16xf32>
    %290 = arith.mulf %289, %288 : vector<8x16xf32>
    %cst_117 = arith.constant 5.000000e-01 : f32
    %291 = vector.broadcast %cst_117 : f32 to vector<8x16xf32>
    %292 = arith.addf %290, %291 : vector<8x16xf32>
    %293 = vector.extract_strided_slice %284 {offsets = [0, 16], sizes = [8, 16], strides = [1, 1]} : vector<8x128xf32> to vector<8x16xf32>
    %cst_118 = arith.constant 5.000000e-01 : f32
    %294 = vector.broadcast %cst_118 : f32 to vector<8x16xf32>
    %295 = arith.mulf %294, %293 : vector<8x16xf32>
    %296 = math.tanh %295 : vector<8x16xf32>
    %cst_119 = arith.constant 5.000000e-01 : f32
    %297 = vector.broadcast %cst_119 : f32 to vector<8x16xf32>
    %298 = arith.mulf %297, %296 : vector<8x16xf32>
    %cst_120 = arith.constant 5.000000e-01 : f32
    %299 = vector.broadcast %cst_120 : f32 to vector<8x16xf32>
    %300 = arith.addf %298, %299 : vector<8x16xf32>
    %301 = vector.extract_strided_slice %284 {offsets = [0, 32], sizes = [8, 16], strides = [1, 1]} : vector<8x128xf32> to vector<8x16xf32>
    %302 = math.tanh %301 : vector<8x16xf32>
    %303 = vector.extract_strided_slice %284 {offsets = [0, 48], sizes = [8, 16], strides = [1, 1]} : vector<8x128xf32> to vector<8x16xf32>
    %cst_121 = arith.constant 5.000000e-01 : f32
    %304 = vector.broadcast %cst_121 : f32 to vector<8x16xf32>
    %305 = arith.mulf %304, %303 : vector<8x16xf32>
    %306 = math.tanh %305 : vector<8x16xf32>
    %cst_122 = arith.constant 5.000000e-01 : f32
    %307 = vector.broadcast %cst_122 : f32 to vector<8x16xf32>
    %308 = arith.mulf %307, %306 : vector<8x16xf32>
    %cst_123 = arith.constant 5.000000e-01 : f32
    %309 = vector.broadcast %cst_123 : f32 to vector<8x16xf32>
    %310 = arith.addf %308, %309 : vector<8x16xf32>
    %311 = arith.mulf %300, %275 : vector<8x16xf32>
    %312 = arith.mulf %292, %302 : vector<8x16xf32>
    %313 = arith.addf %311, %312 : vector<8x16xf32>
    %314 = math.tanh %313 : vector<8x16xf32>
    %315 = arith.mulf %310, %314 : vector<8x16xf32>
    %c8_i32_124 = arith.constant 8 : i32
    %c0_125 = arith.constant 0 : index
    %c0_126 = arith.constant 0 : index
    %316 = vector.load %arg11[%c0_125, %c0_126] : memref<8x16xf32, #tpu.memory_space<vmem>>, vector<8x16xf32>
    tpu.vector_store %arg11[%c0_125, %c0_126], %315 {strides = array<i32>} : memref<8x16xf32, #tpu.memory_space<vmem>>, vector<8x16xf32>,
    %c0_127 = arith.constant 0 : index
    %c0_128 = arith.constant 0 : index
    %317 = vector.load %arg12[%c0_127, %c0_128] : memref<8x16xf32, #tpu.memory_space<vmem>>, vector<8x16xf32>
    tpu.vector_store %arg12[%c0_127, %c0_128], %313 {strides = array<i32>} : memref<8x16xf32, #tpu.memory_space<vmem>>, vector<8x16xf32>,
    %c0_i32_129 = arith.constant 0 : i32
    %318 = arith.cmpi eq, %arg0, %c0_i32_129 : i32
    %319 = arith.extui %318 : i1 to i32
    %c0_i32_130 = arith.constant 0 : i32
    %320 = arith.cmpi ne, %319, %c0_i32_130 : i32
    scf.if %320 {
      %c56 = arith.constant 56 : index
      %c0_131 = arith.constant 0 : index
      %321 = vector.load %arg1[%c56, %c0_131] : memref<64x64xf32, #tpu.memory_space<vmem>>, vector<8x64xf32>
      %c0_132 = arith.constant 0 : index
      %c0_133 = arith.constant 0 : index
      %322 = vector.load %arg5[%c0_132, %c0_133] : memref<64x128xf32, #tpu.memory_space<vmem>>, vector<64x128xf32>
      %cst_134 = arith.constant dense<0.000000e+00> : vector<8x128xf32>
      %323 = tpu.matmul %321, %322, %cst_134 {dimension_numbers = #tpu.dot_dimension_numbers<[1], [0], [0], [1], [0, 0, 1, 1], [], []>} : vector<8x64xf32>, vector<64x128xf32>, vector<8x128xf32> -> vector<8x128xf32>
      %c0_135 = arith.constant 0 : index
      %c0_136 = arith.constant 0 : index
      %324 = vector.load %arg6[%c0_135, %c0_136] : memref<1x128xf32, #tpu.memory_space<vmem>>, vector<1x128xf32>
      %325 = vector.broadcast %324 : vector<1x128xf32> to vector<8x128xf32>
      %326 = arith.addf %323, %325 : vector<8x128xf32>
      %327 = vector.extract_strided_slice %326 {offsets = [0, 0], sizes = [8, 16], strides = [1, 1]} : vector<8x128xf32> to vector<8x16xf32>
      %cst_137 = arith.constant 5.000000e-01 : f32
      %328 = vector.broadcast %cst_137 : f32 to vector<8x16xf32>
      %329 = arith.mulf %328, %327 : vector<8x16xf32>
      %330 = math.tanh %329 : vector<8x16xf32>
      %cst_138 = arith.constant 5.000000e-01 : f32
      %331 = vector.broadcast %cst_138 : f32 to vector<8x16xf32>
      %332 = arith.mulf %331, %330 : vector<8x16xf32>
      %cst_139 = arith.constant 5.000000e-01 : f32
      %333 = vector.broadcast %cst_139 : f32 to vector<8x16xf32>
      %334 = arith.addf %332, %333 : vector<8x16xf32>
      %335 = vector.extract_strided_slice %326 {offsets = [0, 16], sizes = [8, 16], strides = [1, 1]} : vector<8x128xf32> to vector<8x16xf32>
      %336 = math.tanh %335 : vector<8x16xf32>
      %337 = vector.extract_strided_slice %326 {offsets = [0, 32], sizes = [8, 16], strides = [1, 1]} : vector<8x128xf32> to vector<8x16xf32>
      %cst_140 = arith.constant 5.000000e-01 : f32
      %338 = vector.broadcast %cst_140 : f32 to vector<8x16xf32>
      %339 = arith.mulf %338, %337 : vector<8x16xf32>
      %340 = math.tanh %339 : vector<8x16xf32>
      %cst_141 = arith.constant 5.000000e-01 : f32
      %341 = vector.broadcast %cst_141 : f32 to vector<8x16xf32>
      %342 = arith.mulf %341, %340 : vector<8x16xf32>
      %cst_142 = arith.constant 5.000000e-01 : f32
      %343 = vector.broadcast %cst_142 : f32 to vector<8x16xf32>
      %344 = arith.addf %342, %343 : vector<8x16xf32>
      %345 = arith.mulf %334, %336 : vector<8x16xf32>
      %346 = math.tanh %345 : vector<8x16xf32>
      %347 = arith.mulf %344, %346 : vector<8x16xf32>
      %348 = tpu.concatenate %315, %347 in 1 : vector<8x16xf32>, vector<8x16xf32> -> vector<8x32xf32>
      %c0_143 = arith.constant 0 : index
      %c0_144 = arith.constant 0 : index
      %349 = vector.load %arg7[%c0_143, %c0_144] : memref<32x128xf32, #tpu.memory_space<vmem>>, vector<32x128xf32>
      %cst_145 = arith.constant dense<0.000000e+00> : vector<8x128xf32>
      %350 = tpu.matmul %348, %349, %cst_145 {dimension_numbers = #tpu.dot_dimension_numbers<[1], [0], [0], [1], [0, 0, 1, 1], [], []>} : vector<8x32xf32>, vector<32x128xf32>, vector<8x128xf32> -> vector<8x128xf32>
      %c0_146 = arith.constant 0 : index
      %c0_147 = arith.constant 0 : index
      %351 = vector.load %arg8[%c0_146, %c0_147] : memref<1x128xf32, #tpu.memory_space<vmem>>, vector<1x128xf32>
      %352 = vector.broadcast %351 : vector<1x128xf32> to vector<8x128xf32>
      %353 = arith.addf %350, %352 : vector<8x128xf32>
      %cst_148 = arith.constant dense<0xFF800000> : vector<8xf32>
      %354 = vector.multi_reduction <maximumf>, %353, %cst_148 [1] : vector<8x128xf32> to vector<8xf32>
      %355 = vector.shape_cast %354 : vector<8xf32> to vector<8x1xf32>
      %356 = vector.broadcast %355 : vector<8x1xf32> to vector<8x128xf32>
      %357 = arith.subf %353, %356 : vector<8x128xf32>
      %358 = math.exp %357 : vector<8x128xf32>
      %cst_149 = arith.constant dense<0.000000e+00> : vector<8xf32>
      %359 = vector.multi_reduction <add>, %358, %cst_149 [1] : vector<8x128xf32> to vector<8xf32>
      %360 = vector.shape_cast %359 : vector<8xf32> to vector<8x1xf32>
      %361 = math.log %360 : vector<8x1xf32>
      %362 = vector.broadcast %361 : vector<8x1xf32> to vector<8x128xf32>
      %363 = arith.subf %357, %362 : vector<8x128xf32>
      %c0_150 = arith.constant 0 : index
      %c0_151 = arith.constant 0 : index
      %364 = vector.load %arg9[%c0_150, %c0_151] : memref<8x128xf32, #tpu.memory_space<vmem>>, vector<8x128xf32>
      tpu.vector_store %arg9[%c0_150, %c0_151], %363 {strides = array<i32>} : memref<8x128xf32, #tpu.memory_space<vmem>>, vector<8x128xf32>,
    } else {
    }
    return
  }
  func.func @transform_0(%arg0: i32) -> (i32, i32) {
    %c0_i32 = arith.constant 0 : i32
    %c0_i32_0 = arith.constant 0 : i32
    return %arg0, %c0_i32 : i32, i32
  }
  func.func @transform_1(%arg0: i32) -> (i32, i32) {
    %c0_i32 = arith.constant 0 : i32
    %c0_i32_0 = arith.constant 0 : i32
    %c0_i32_1 = arith.constant 0 : i32
    return %c0_i32, %c0_i32_0 : i32, i32
  }
  func.func @transform_2(%arg0: i32) -> (i32, i32) {
    %c0_i32 = arith.constant 0 : i32
    %c0_i32_0 = arith.constant 0 : i32
    %c0_i32_1 = arith.constant 0 : i32
    return %c0_i32, %c0_i32_0 : i32, i32
  }
  func.func @transform_3(%arg0: i32) -> (i32, i32) {
    %c0_i32 = arith.constant 0 : i32
    %c0_i32_0 = arith.constant 0 : i32
    %c0_i32_1 = arith.constant 0 : i32
    return %c0_i32, %c0_i32_0 : i32, i32
  }
  func.func @transform_4(%arg0: i32) -> (i32, i32) {
    %c0_i32 = arith.constant 0 : i32
    %c0_i32_0 = arith.constant 0 : i32
    %c0_i32_1 = arith.constant 0 : i32
    return %c0_i32, %c0_i32_0 : i32, i32
  }
  func.func @transform_5(%arg0: i32) -> (i32, i32) {
    %c0_i32 = arith.constant 0 : i32
    %c0_i32_0 = arith.constant 0 : i32
    %c0_i32_1 = arith.constant 0 : i32
    return %c0_i32, %c0_i32_0 : i32, i32
  }
  func.func @transform_6(%arg0: i32) -> (i32, i32) {
    %c0_i32 = arith.constant 0 : i32
    %c0_i32_0 = arith.constant 0 : i32
    %c0_i32_1 = arith.constant 0 : i32
    return %c0_i32, %c0_i32_0 : i32, i32
  }
  func.func @transform_7(%arg0: i32) -> (i32, i32) {
    %c0_i32 = arith.constant 0 : i32
    %c0_i32_0 = arith.constant 0 : i32
    %c0_i32_1 = arith.constant 0 : i32
    return %c0_i32, %c0_i32_0 : i32, i32
  }
  func.func @transform_8(%arg0: i32) -> (i32, i32) {
    %c0_i32 = arith.constant 0 : i32
    %c0_i32_0 = arith.constant 0 : i32
    %c0_i32_1 = arith.constant 0 : i32
    return %c0_i32, %c0_i32_0 : i32, i32
  }
}

</mosaic_0001>

<bundles_post_ra>
// kernel: tpu_custom_call.1
= control target key start
LH: loop header
LB: loop body
LE: loop exit
PB: predicated region body
PF: predicated region fallthrough
CT: control target
= control target key end

     0   :  { %13 = vsyncpa [#allocation6], 0  ;;  %s1207_s0 = inlined_call_operand.hbm [shape: f32[64,64], index: 0, kind: input, shape index: {}]   ;;  %s1208_s1 = inlined_call_operand.hbm [shape: f32[64,128], index: 1, kind: input, shape index: {}]   ;;  %s1209_s2 = inlined_call_operand.hbm [shape: f32[16,128], index: 2, kind: input, shape index: {}]   ;;  %s1210_s3 = inlined_call_operand.vmem [shape: f32[1,128], index: 3, kind: input, shape index: {}]   ;;  %s1211_s4 = inlined_call_operand.hbm [shape: f32[64,128], index: 4, kind: input, shape index: {}]   ;;  %s1212_s5 = inlined_call_operand.vmem [shape: f32[1,128], index: 5, kind: input, shape index: {}]   ;;  %s1213_s6 = inlined_call_operand.hbm [shape: f32[32,128], index: 6, kind: input, shape index: {}]   ;;  %s1214_s7 = inlined_call_operand.vmem [shape: f32[1,128], index: 7, kind: input, shape index: {}]   ;;  %s1215_s8 = inlined_call_operand.hbm [shape: f32[8,128], index: 8, kind: output, shape index: {}]  }
   0x1   :  { %14 = vsyncpa [#allocation9], 0 }
   0x2   :  { %15 = vsyncpa [#allocation12], 0 }
   0x3   :  { %16 = vsyncpa [#allocation7], 0  ;;  %s34_s29 = sshll.u32 %s1208_s1, 4  ;;  %s1016_s30 = smov [#allocation8]   ;;  %s35_s29 = int_to_ptr.hbm [resolvable:$true] %s34_s29 }
   0x4   :  { %s36_s9 = sshll.u32 %s1016_s30, 4  ;;  %s62_s12 = sshll.u32 %s1211_s4, 4  ;;  %s37_s9 = int_to_ptr.vmem [resolvable:$true] %s36_s9  ;;  %s63_s12 = int_to_ptr.hbm [resolvable:$true] %s62_s12 }
   0x5   :  { %s1017_s13 = smov 128   ;;  %s1018_s14 = smov 8  }
   0x6   :  { %42 = dma.hbm_to_vmem [thread:$0]  %s35_s29, 1024, %s37_s9, [#allocation9], %s1017_s13, %s1017_s13, %s1018_s14  }
   0x7   :  { %s1019_s15 = smov [#allocation11]   ;;  %s21_s19 = sshll.u32 %s1207_s0, 4  ;;  %s22_s19 = int_to_ptr.hbm [resolvable:$true] %s21_s19 }
   0x8   :  { %s64_s16 = sshll.u32 %s1019_s15, 4  ;;  %s47_s21 = sshll.u32 %s1209_s2, 4  ;;  %s65_s16 = int_to_ptr.vmem [resolvable:$true] %s64_s16  ;;  %s48_s21 = int_to_ptr.hbm [resolvable:$true] %s47_s21 }
   0x9   :  { %70 = dma.hbm_to_vmem [thread:$0]  %s63_s12, 1024, %s65_s16, [#allocation12], %s1017_s13, %s1017_s13, %s1018_s14  }
   0xa   :  { %s1020_s22 = smov [#allocation5]   ;;  %s1021_s4 = smov [#allocation10]  }
   0xb   :  { %s23_s23 = sshll.u32 %s1020_s22, 4  ;;  %s49_s24 = sshll.u32 %s1021_s4, 4  ;;  %s24_s23 = int_to_ptr.vmem [resolvable:$true] %s23_s23  ;;  %s50_s24 = int_to_ptr.vmem [resolvable:$true] %s49_s24 }
   0xc   :  { %29 = dma.hbm_to_vmem [thread:$0]  %s22_s19, 1024, %s24_s23, [#allocation6], %s1017_s13, %s1017_s13, %s1018_s14  }
   0xd   :  { %s77_s27 = sshll.u32 %s1213_s6, 4  ;;  %s1022_s0 = smov [#allocation13]   ;;  %s78_s27 = int_to_ptr.hbm [resolvable:$true] %s77_s27 }
   0xe   :  { %55 = dma.hbm_to_vmem [thread:$0]  %s48_s21, 256, %s50_s24, [#allocation9], %s1017_s13, %s1017_s13, %s1018_s14  }
   0xf   :  { %s79_s28 = sshll.u32 %s1022_s0, 4  ;;  %s80_s28 = int_to_ptr.vmem [resolvable:$true] %s79_s28 }
  0x10   :  { %85 = dma.hbm_to_vmem [thread:$0]  %s78_s27, 512, %s80_s28, [#allocation12], %s1017_s13, %s1017_s13, %s1018_s14  }
  0x11   :  { %1008 = dma.done.wait [#allocation6], 1024  }
  0x12   :  { %1009 = vsyncadd [#allocation6], 4294966272 }
  0x13   :  { %1010 = dma.done.wait [#allocation9], 1280  }
  0x14   :  { %1011 = vsyncadd [#allocation9], 4294966016 }
  0x15   :  { %1012 = dma.done.wait [#allocation12], 1536  }
  0x16   :  { %1013 = vsyncadd [#allocation12], 4294965760  ;;  %vm112_vm0 = vcmask 130048   ;;  %v1023_v0 = vmov 0.0   ;;  %v130_v1 = vld [vmem:[#allocation8 + $0x38] sm:$0xff]  ;;  %v129_v2 = vld [vmem:[#allocation8 + $0x30] sm:$0xff] }
  0x17   :  { %113 = vst.msk [vmem:[#allocation3] sm:$0xff] %vm112_vm0, %v1023_v0  ;;  %765 = vmatpush.msra.mxu1 %v130_v1  ;;  %168 = vmatpush.msra.mxu0 %v130_v1  ;;  %v128_v3 = vld [vmem:[#allocation8 + $0x28] sm:$0xff]  ;;  %v127_v4 = vld [vmem:[#allocation8 + $0x20] sm:$0xff]  ;;  %v126_v5 = vld [vmem:[#allocation8 + $0x18] sm:$0xff]  ;;  %vm135_vm1 = vcmask 523264   ;;  %s1024_s29 = smov 96  }
  0x18   :  { %114 = vst.msk [vmem:[#allocation4] sm:$0xff] %vm112_vm0, %v1023_v0  ;;  %766 = vmatpush.msra.mxu2 %v130_v1  ;;  %767 = vmatpush.msra.mxu3 %v130_v1  ;;  %v125_v6 = vld [vmem:[#allocation8 + $0x10] sm:$0xff]  ;;  %v124_v7 = vld [vmem:[#allocation8 + $0x8] sm:$0xff]  ;;  %v123_v8 = vld [vmem:[#allocation8] sm:$0xff]  ;;  %s1025_s30 = smov 16   ;;  %s1027_s9 = smov 80  }
  0x19   :  { %768 = vmatpush.msra.mxu1 %v129_v2  ;;  %169 = vmatpush.msra.mxu0 %v129_v2  ;;  %v119_v9 = vld [vmem:[#allocation5 + $0x20] sm:$0xff]  ;;  %v1092_v11 = vld [vmem:[#allocation10 + $0x8] sm:$0xff]  ;;  %v1114_v16 = vld [vmem:[%s1210_s3] ss:$0 sm:$0xff]  ;;  %s1026_s3 = smov 32   ;;  %s1028_s12 = smov 112  }
  0x1a   :  { %769 = vmatpush.msra.mxu2 %v129_v2  ;;  %770 = vmatpush.msra.mxu3 %v129_v2  ;;  %v115_v10 = vld [vmem:[#allocation5] sm:$0xff]  ;;  %v120_v33 = vld [vmem:[#allocation5 + $0x28] sm:$0xff]  ;;  %v121_v34 = vld [vmem:[#allocation5 + $0x30] sm:$0xff]  ;;  %vm693_vm2 = vcmask 261120   ;;  %s1029_s14 = smov [#allocation14]   ;;  %s735_s18 = sshll.u32 %s1215_s8, 4  ;;  %s736_s18 = int_to_ptr.hbm [resolvable:$true] %s735_s18 }
  0x1b   :  { %771 = vmatpush.msra.mxu1 %v128_v3  ;;  %170 = vmatpush.msra.mxu0 %v128_v3  ;;  %v1095_v12 = vld [vmem:[#allocation10] sm:$0xff]  ;;  %v116_v37 = vld [vmem:[#allocation5 + $0x8] sm:$0xff]  ;;  %v1138_v56 = vld [vmem:[#allocation5 + $0x38] sm:$0xff]  ;;  %s733_s15 = sshll.u32 %s1029_s14, 4  ;;  %s734_s15 = int_to_ptr.vmem [resolvable:$true] %s733_s15 }
  0x1c   :  { %772 = vmatpush.msra.mxu2 %v128_v3  ;;  %773 = vmatpush.msra.mxu3 %v128_v3  ;;  %v117_v59 = vld [vmem:[#allocation5 + $0x10] sm:$0xff] }
  0x1d   :  { %774 = vmatpush.msra.mxu1 %v127_v4  ;;  %171 = vmatpush.msra.mxu0 %v127_v4 }
  0x1e   :  { %775 = vmatpush.msra.mxu2 %v127_v4  ;;  %776 = vmatpush.msra.mxu3 %v127_v4  ;;  %v209_v13 = vld [vmem:[#allocation3] sm:$0xff] }
  0x1f   :  { %777 = vmatpush.msra.mxu1 %v126_v5  ;;  %172 = vmatpush.msra.mxu0 %v126_v5  ;;  %v210_v21 = vld [vmem:[#allocation4] sm:$0xff] }
  0x20   :  { %778 = vmatpush.msra.mxu2 %v126_v5  ;;  %779 = vmatpush.msra.mxu3 %v126_v5 }
  0x21   :  { %780 = vmatpush.msra.mxu1 %v125_v6  ;;  %173 = vmatpush.msra.mxu0 %v125_v6 }
  0x22   :  { %781 = vmatpush.msra.mxu2 %v125_v6  ;;  %782 = vmatpush.msra.mxu3 %v125_v6 }
  0x23   :  { %783 = vmatpush.msra.mxu1 %v124_v7  ;;  %174 = vmatpush.msra.mxu0 %v124_v7 }
  0x24   :  { %784 = vmatpush.msra.mxu2 %v124_v7  ;;  %785 = vmatpush.msra.mxu3 %v124_v7 }
  0x25   :  { %786 = vmatpush.msra.mxu1 %v123_v8  ;;  %175 = vmatpush.msra.mxu0 %v123_v8 }
  0x26   :  { %751 = vmatmul.msk.f32.vlgmr.msra.gmra.mxu1 %vm135_vm1, %v119_v9  ;;  %747 = vmatmul.msk.f32.vlgmr.msra.gmra.mxu0 %vm135_vm1, %v115_v10 }
  0x27   :  { %232 = vmatpush.msrb.mxu1 %v1092_v11  ;;  %787 = vmatpush.msra.mxu2 %v123_v8 }
  0x28   :  { %788 = vmatpush.msra.mxu3 %v123_v8  ;;  %752 = vmatmul.msk.f32.vlgmr.msra.gmra.mxu2 %vm135_vm1, %v120_v33 }
  0x29   :  { %286 = vmatpush.msrb.mxu2 %v1092_v11  ;;  %233 = vmatpush.msrb.mxu1 %v1095_v12 }
  0x2a   :  { %336 = vmatpush.msrb.mxu3 %v1092_v11 }
  0x2b   :  { %287 = vmatpush.msrb.mxu2 %v1095_v12  ;;  %386 = vmatpush.msra.mxu1 %v1092_v11 }
  0x2c   :  { %337 = vmatpush.msrb.mxu3 %v1095_v12 }
  0x2d   :  { %387 = vmatpush.msra.mxu1 %v1095_v12  ;;  %436 = vmatpush.msra.mxu2 %v1092_v11 }
  0x2e   :  { %755 = vmatmul.msk.f32.vlgmr.msrb.gmra.mxu1 %vm112_vm0, %v209_v13  ;;  %748 = vmatmul.msk.f32.gmra.mxu0 %vm135_vm1, %v116_v37  ;;  %v118_v13 = vld [vmem:[#allocation5 + $0x18] sm:$0xff] }
  0x2f   :  { %536 = vmatpush.msrb.mxu1 %v1092_v11  ;;  %437 = vmatpush.msra.mxu2 %v1095_v12 }
  0x30   :  { %753 = vmatmul.msk.f32.gmra.mxu2 %vm135_vm1, %v121_v34  ;;  %754 = vmatmul.msk.f32.vlgmr.msra.gmra.mxu3 %vm135_vm1, %v1138_v56 }
  0x31   :  { %537 = vmatpush.msrb.mxu1 %v1095_v12  ;;  %486 = vmatpush.msra.mxu3 %v1092_v11 }
  0x33   :  { %487 = vmatpush.msra.mxu3 %v1095_v12 }
  0x36   :  { %749 = vmatmul.msk.f32.gmra.mxu0 %vm135_vm1, %v117_v59 }
  0x3e   :  { %750 = vmatmul.msk.f32.gmra.mxu0 %vm135_vm1, %v118_v13 }
  0xa3   :  { %v1109_v14 = vpop.f32.mrf.mxu1  ;;  %v177_v15 = vpop.f32.mrf.mxu0 }
  0xa4   :  { %v178_v17 = vadd.f32 %v1114_v16, %v177_v15  ;;  %v190_v37 = vadd.f32 %v1114_v16, %v1109_v14 }
  0xab   :  { %v235_v18 = vpop.f32.mrf.mxu1  ;;  %v1130_v39 = vpop.f32.mrf.mxu2 }
  0xac   :  { %v238_v19 = vadd.f32 %v235_v18, %v178_v17  ;;  %v180_v41 = vpop.f32.mrf.mxu0 }
  0xad   :  { %v181_v42 = vadd.f32 %v1114_v16, %v180_v41 }
  0xae   :  { %806 = vtanh.f32 %v238_v19  ;;  %v239_v22 = vmul.f32 0.5, %v238_v19 }
  0xb0   :  { %808 = vtanh.f32 %v239_v22 }
  0xb3   :  { %v1132_v40 = vpop.f32.mrf.mxu2  ;;  %v1147_v61 = vpop.f32.mrf.mxu3 }
  0xb4   :  { %v807_v20 = vpop.eup %806  ;;  %v183_v62 = vpop.f32.mrf.mxu0 }
  0xb5   :  { %250 = vrot.lane.b32.xlu0 %v807_v20, %s1024_s29  ;;  %v184_v63 = vadd.f32 %v1114_v16, %v183_v62 }
  0xb6   :  { %v809_v23 = vpop.eup %808 }
  0xb7   :  { %v241_v24 = vmul.f32 0.5, %v809_v23 }
  0xb9   :  { %v242_v25 = vadd.f32 0.5, %v241_v24 }
  0xbc   :  { %v186_v19 = vpop.f32.mrf.mxu0 }
  0xbd   :  { %245 = vrot.lane.b32.xlu0 %v210_v21, %s1025_s30  ;;  %v187_v20 = vadd.f32 %v1114_v16, %v186_v19 }
 0x127   :  { %v251_v26 = vpop.permute.xlu0 %250 }
 0x128   :  { %v253_v27 = vmul.f32 %v251_v26, %v242_v25 }
 0x12a   :  { %255 = vrot.lane.b32.xlu1 %v253_v27, %s1025_s30 }
 0x12f   :  { %v246_v28 = vpop.permute.xlu0 %245 }
 0x130   :  { %v248_v29 = vmul.f32 %v246_v28, %v242_v25 }
 0x19c   :  { %v256_v30 = vpop.permute.xlu1 %255 }
 0x19d   :  { %v258_v31 = vadd.f32 %v256_v30, %v248_v29 }
 0x19f   :  { %810 = vtanh.f32 %v258_v31 }
 0x1a5   :  { %v811_v32 = vpop.eup %810 }
 0x1a6   :  { %261 = vrot.lane.b32.xlu1 %v811_v32, %s1026_s3 }
 0x218   :  { %v262_v35 = vpop.permute.xlu1 %261 }
 0x219   :  { %v264_v36 = vmul.f32 %v262_v35, %v242_v25 }
 0x21b   :  { %268 = vrot.lane.b32.xlu2 %v264_v36, %s1027_s9 }
 0x275   :  { %v269_v38 = vpop.permute.xlu2 %268 }
 0x276   :  { %756 = vmatmul.msk.f32.vlgmr.msrb.gmra.mxu2 %vm112_vm0, %v269_v38 }
 0x277   :  { %586 = vmatpush.msrb.mxu2 %v1092_v11 }
 0x279   :  { %587 = vmatpush.msrb.mxu2 %v1095_v12 }
 0x2f9   :  { %v289_v43 = vpop.f32.mrf.mxu2 }
 0x2fa   :  { %v292_v44 = vadd.f32 %v289_v43, %v181_v42 }
 0x2fc   :  { %812 = vtanh.f32 %v292_v44  ;;  %v293_v46 = vmul.f32 0.5, %v292_v44 }
 0x2fe   :  { %814 = vtanh.f32 %v293_v46 }
 0x302   :  { %v813_v45 = vpop.eup %812 }
 0x303   :  { %300 = vrot.lane.b32.xlu2 %v813_v45, %s1024_s29 }
 0x304   :  { %v815_v47 = vpop.eup %814 }
 0x305   :  { %v295_v48 = vmul.f32 0.5, %v815_v47 }
 0x307   :  { %v296_v49 = vadd.f32 0.5, %v295_v48 }
 0x309   :  { %v298_v52 = vmul.f32 %v296_v49, %v258_v31 }
 0x35d   :  { %v301_v50 = vpop.permute.xlu2 %300 }
 0x35e   :  { %v303_v51 = vmul.f32 %v301_v50, %v296_v49 }
 0x360   :  { %305 = vrot.lane.b32.xlu0 %v303_v51, %s1025_s30 }
 0x3d2   :  { %v306_v53 = vpop.permute.xlu0 %305 }
 0x3d3   :  { %v308_v54 = vadd.f32 %v306_v53, %v298_v52 }
 0x3d5   :  { %816 = vtanh.f32 %v308_v54 }
 0x3db   :  { %v817_v55 = vpop.eup %816 }
 0x3dc   :  { %311 = vrot.lane.b32.xlu1 %v817_v55, %s1026_s3  ;;  %v193_v55 = vadd.f32 %v1114_v16, %v1130_v39 }
 0x44e   :  { %v312_v57 = vpop.permute.xlu1 %311 }
 0x44f   :  { %v314_v58 = vmul.f32 %v312_v57, %v296_v49 }
 0x451   :  { %318 = vrot.lane.b32.xlu2 %v314_v58, %s1027_s9 }
 0x4ab   :  { %v319_v60 = vpop.permute.xlu2 %318 }
 0x4ac   :  { %757 = vmatmul.msk.f32.vlgmr.msrb.gmra.mxu3 %vm112_vm0, %v319_v60 }
 0x52f   :  { %v339_v0 = vpop.f32.mrf.mxu3 }
 0x530   :  { %v342_v1 = vadd.f32 %v339_v0, %v184_v63 }
 0x532   :  { %818 = vtanh.f32 %v342_v1  ;;  %v343_v3 = vmul.f32 0.5, %v342_v1 }
 0x534   :  { %820 = vtanh.f32 %v343_v3 }
 0x538   :  { %v819_v2 = vpop.eup %818 }
 0x539   :  { %350 = vrot.lane.b32.xlu0 %v819_v2, %s1024_s29 }
 0x53a   :  { %v821_v4 = vpop.eup %820 }
 0x53b   :  { %v345_v5 = vmul.f32 0.5, %v821_v4 }
 0x53d   :  { %v346_v6 = vadd.f32 0.5, %v345_v5 }
 0x53f   :  { %v348_v9 = vmul.f32 %v346_v6, %v308_v54 }
 0x5ab   :  { %v351_v7 = vpop.permute.xlu0 %350 }
 0x5ac   :  { %v353_v8 = vmul.f32 %v351_v7, %v346_v6 }
 0x5ae   :  { %355 = vrot.lane.b32.xlu1 %v353_v8, %s1025_s30 }
 0x620   :  { %v356_v10 = vpop.permute.xlu1 %355 }
 0x621   :  { %v358_v11 = vadd.f32 %v356_v10, %v348_v9  ;;  %v196_v9 = vadd.f32 %v1114_v16, %v1132_v40 }
 0x623   :  { %822 = vtanh.f32 %v358_v11 }
 0x629   :  { %v823_v12 = vpop.eup %822 }
 0x62a   :  { %361 = vrot.lane.b32.xlu2 %v823_v12, %s1026_s3 }
 0x684   :  { %v362_v15 = vpop.permute.xlu2 %361 }
 0x685   :  { %v364_v17 = vmul.f32 %v362_v15, %v346_v6 }
 0x687   :  { %368 = vrot.lane.b32.xlu0 %v364_v17, %s1027_s9 }
 0x6f9   :  { %v369_v18 = vpop.permute.xlu0 %368 }
 0x6fa   :  { %758 = vmatmul.msk.f32.vlgmr.msra.gmra.mxu1 %vm112_vm0, %v369_v18 }
 0x777   :  { %v389_v21 = vpop.f32.mrf.mxu1 }
 0x778   :  { %v392_v22 = vadd.f32 %v389_v21, %v187_v20 }
 0x77a   :  { %824 = vtanh.f32 %v392_v22  ;;  %v393_v24 = vmul.f32 0.5, %v392_v22 }
 0x77c   :  { %826 = vtanh.f32 %v393_v24  ;;  %v636_v24 = vld [vmem:[#allocation11 + $0x38] sm:$0xff] }
 0x77d   :  { %652 = vmatpush.msrb.mxu3 %v636_v24 }
 0x780   :  { %v825_v23 = vpop.eup %824 }
 0x781   :  { %400 = vrot.lane.b32.xlu1 %v825_v23, %s1024_s29 }
 0x782   :  { %v827_v25 = vpop.eup %826 }
 0x783   :  { %v395_v26 = vmul.f32 0.5, %v827_v25  ;;  %v635_v25 = vld [vmem:[#allocation11 + $0x30] sm:$0xff] }
 0x784   :  { %653 = vmatpush.msrb.mxu3 %v635_v25 }
 0x785   :  { %v396_v27 = vadd.f32 0.5, %v395_v26  ;;  %v634_v26 = vld [vmem:[#allocation11 + $0x28] sm:$0xff] }
 0x786   :  { %654 = vmatpush.msrb.mxu3 %v634_v26 }
 0x787   :  { %v398_v30 = vmul.f32 %v396_v27, %v358_v11 }
 0x7f3   :  { %v401_v28 = vpop.permute.xlu1 %400 }
 0x7f4   :  { %v403_v29 = vmul.f32 %v401_v28, %v396_v27  ;;  %v632_v28 = vld [vmem:[#allocation11 + $0x18] sm:$0xff] }
 0x7f6   :  { %405 = vrot.lane.b32.xlu2 %v403_v29, %s1025_s30  ;;  %v631_v29 = vld [vmem:[#allocation11 + $0x10] sm:$0xff] }
 0x850   :  { %v406_v31 = vpop.permute.xlu2 %405 }
 0x851   :  { %v408_v32 = vadd.f32 %v406_v31, %v398_v30  ;;  %v630_v30 = vld [vmem:[#allocation11 + $0x8] sm:$0xff]  ;;  %v629_v31 = vld [vmem:[#allocation11] sm:$0xff] }
 0x853   :  { %828 = vtanh.f32 %v408_v32 }
 0x859   :  { %v829_v33 = vpop.eup %828 }
 0x85a   :  { %411 = vrot.lane.b32.xlu0 %v829_v33, %s1026_s3 }
 0x8cc   :  { %v412_v34 = vpop.permute.xlu0 %411 }
 0x8cd   :  { %v414_v35 = vmul.f32 %v412_v34, %v396_v27  ;;  %v633_v27 = vld [vmem:[#allocation11 + $0x20] sm:$0xff] }
 0x8ce   :  { %655 = vmatpush.msrb.mxu3 %v633_v27  ;;  %v804_v34 = vld [vmem:[%s1212_s5] ss:$0 sm:$0xff] }
 0x8cf   :  { %418 = vrot.lane.b32.xlu1 %v414_v35, %s1027_s9 }
 0x8d0   :  { %656 = vmatpush.msrb.mxu3 %v632_v28 }
 0x8d2   :  { %657 = vmatpush.msrb.mxu3 %v631_v29 }
 0x8d4   :  { %658 = vmatpush.msrb.mxu3 %v630_v30 }
 0x8d6   :  { %659 = vmatpush.msrb.mxu3 %v629_v31 }
 0x941   :  { %v419_v36 = vpop.permute.xlu1 %418 }
 0x942   :  { %759 = vmatmul.msk.f32.vlgmr.msra.gmra.mxu2 %vm112_vm0, %v419_v36 }
 0x9c5   :  { %v439_v38 = vpop.f32.mrf.mxu2 }
 0x9c6   :  { %v442_v41 = vadd.f32 %v439_v38, %v190_v37 }
 0x9c8   :  { %830 = vtanh.f32 %v442_v41  ;;  %v443_v43 = vmul.f32 0.5, %v442_v41 }
 0x9ca   :  { %832 = vtanh.f32 %v443_v43 }
 0x9ce   :  { %v831_v42 = vpop.eup %830 }
 0x9cf   :  { %450 = vrot.lane.b32.xlu2 %v831_v42, %s1024_s29 }
 0x9d0   :  { %v833_v44 = vpop.eup %832 }
 0x9d1   :  { %v445_v45 = vmul.f32 0.5, %v833_v44 }
 0x9d3   :  { %v446_v46 = vadd.f32 0.5, %v445_v45 }
 0x9d5   :  { %v448_v49 = vmul.f32 %v446_v46, %v408_v32 }
 0xa29   :  { %v451_v47 = vpop.permute.xlu2 %450 }
 0xa2a   :  { %v453_v48 = vmul.f32 %v451_v47, %v446_v46 }
 0xa2c   :  { %455 = vrot.lane.b32.xlu0 %v453_v48, %s1025_s30 }
 0xa9e   :  { %v456_v50 = vpop.permute.xlu0 %455 }
 0xa9f   :  { %v458_v51 = vadd.f32 %v456_v50, %v448_v49 }
 0xaa1   :  { %834 = vtanh.f32 %v458_v51 }
 0xaa7   :  { %v835_v14 = vpop.eup %834 }
 0xaa8   :  { %461 = vrot.lane.b32.xlu1 %v835_v14, %s1026_s3 }
 0xb1a   :  { %v462_v52 = vpop.permute.xlu1 %461 }
 0xb1b   :  { %v464_v53 = vmul.f32 %v462_v52, %v446_v46 }
 0xb1d   :  { %468 = vrot.lane.b32.xlu2 %v464_v53, %s1027_s9 }
 0xb77   :  { %v469_v54 = vpop.permute.xlu2 %468 }
 0xb78   :  { %760 = vmatmul.msk.f32.vlgmr.msra.gmra.mxu3 %vm112_vm0, %v469_v54 }
 0xb80   :  { %763 = vmatmul.msk.f32.vlgmr.msrb.gmra.mxu3 %vm135_vm1, %v1138_v56  ;;  %v199_v56 = vadd.f32 %v1114_v16, %v1147_v61 }
 0xbfb   :  { %v489_v57 = vpop.f32.mrf.mxu3 }
 0xbfc   :  { %v492_v58 = vadd.f32 %v489_v57, %v193_v55 }
 0xbfe   :  { %836 = vtanh.f32 %v492_v58  ;;  %v493_v60 = vmul.f32 0.5, %v492_v58 }
 0xc00   :  { %838 = vtanh.f32 %v493_v60 }
 0xc03   :  { %v661_v36 = vpop.f32.mrf.mxu3 }
 0xc04   :  { %v837_v59 = vpop.eup %836  ;;  %v662_v37 = vadd.f32 %v804_v34, %v661_v36 }
 0xc05   :  { %500 = vrot.lane.b32.xlu0 %v837_v59, %s1024_s29 }
 0xc06   :  { %v839_v62 = vpop.eup %838  ;;  %v664_v44 = vmul.f32 0.5, %v662_v37 }
 0xc07   :  { %v495_v63 = vmul.f32 0.5, %v839_v62  ;;  %v688_v62 = vld [vmem:[#allocation13 + $0x18] sm:$0xff] }
 0xc08   :  { %709 = vmatpush.msra.mxu1 %v688_v62 }
 0xc09   :  { %v496_v0 = vadd.f32 0.5, %v495_v63  ;;  %v687_v63 = vld [vmem:[#allocation13 + $0x10] sm:$0xff] }
 0xc0a   :  { %710 = vmatpush.msra.mxu1 %v687_v63 }
 0xc0b   :  { %v498_v3 = vmul.f32 %v496_v0, %v458_v51 }
 0xc77   :  { %v501_v1 = vpop.permute.xlu0 %500 }
 0xc78   :  { %v503_v2 = vmul.f32 %v501_v1, %v496_v0  ;;  %v685_v1 = vld [vmem:[#allocation13] sm:$0xff] }
 0xc7a   :  { %505 = vrot.lane.b32.xlu1 %v503_v2, %s1025_s30 }
 0xcec   :  { %v506_v4 = vpop.permute.xlu1 %505 }
 0xced   :  { %v508_v5 = vadd.f32 %v506_v4, %v498_v3 }
 0xcef   :  { %840 = vtanh.f32 %v508_v5 }
 0xcf5   :  { %v841_v39 = vpop.eup %840 }
 0xcf6   :  { %511 = vrot.lane.b32.xlu2 %v841_v39, %s1026_s3 }
 0xd50   :  { %v512_v6 = vpop.permute.xlu2 %511 }
 0xd51   :  { %v514_v7 = vmul.f32 %v512_v6, %v496_v0  ;;  %v686_v0 = vld [vmem:[#allocation13 + $0x8] sm:$0xff] }
 0xd52   :  { %711 = vmatpush.msra.mxu1 %v686_v0 }
 0xd53   :  { %518 = vrot.lane.b32.xlu0 %v514_v7, %s1027_s9  ;;  %v805_v7 = vld [vmem:[%s1214_s7] ss:$0 sm:$0xff] }
 0xd54   :  { %712 = vmatpush.msra.mxu1 %v685_v1 }
 0xdc5   :  { %v519_v8 = vpop.permute.xlu0 %518 }
 0xdc6   :  { %761 = vmatmul.msk.f32.vlgmr.msrb.gmra.mxu1 %vm112_vm0, %v519_v8 }
 0xe43   :  { %v539_v10 = vpop.f32.mrf.mxu1 }
 0xe44   :  { %v542_v11 = vadd.f32 %v539_v10, %v196_v9 }
 0xe46   :  { %842 = vtanh.f32 %v542_v11  ;;  %v543_v13 = vmul.f32 0.5, %v542_v11 }
 0xe48   :  { %844 = vtanh.f32 %v543_v13 }
 0xe4c   :  { %v843_v12 = vpop.eup %842 }
 0xe4d   :  { %550 = vrot.lane.b32.xlu1 %v843_v12, %s1024_s29 }
 0xe4e   :  { %v845_v15 = vpop.eup %844 }
 0xe4f   :  { %v545_v17 = vmul.f32 0.5, %v845_v15 }
 0xe51   :  { %v546_v18 = vadd.f32 0.5, %v545_v17 }
 0xe53   :  { %v548_v21 = vmul.f32 %v546_v18, %v508_v5 }
 0xebf   :  { %v551_v19 = vpop.permute.xlu1 %550 }
 0xec0   :  { %v553_v20 = vmul.f32 %v551_v19, %v546_v18 }
 0xec2   :  { %555 = vrot.lane.b32.xlu2 %v553_v20, %s1025_s30 }
 0xf1c   :  { %v556_v22 = vpop.permute.xlu2 %555 }
 0xf1d   :  { %v558_v23 = vadd.f32 %v556_v22, %v548_v21 }
 0xf1f   :  { %846 = vtanh.f32 %v558_v23 }
 0xf20   :  { %848 = vtanh.f32 %v662_v37 }
 0xf25   :  { %v847_v40 = vpop.eup %846 }
 0xf26   :  { %561 = vrot.lane.b32.xlu0 %v847_v40, %s1026_s3  ;;  %v849_v38 = vpop.eup %848 }
 0xf98   :  { %v562_v32 = vpop.permute.xlu0 %561 }
 0xf99   :  { %v564_v33 = vmul.f32 %v562_v32, %v546_v18 }
 0xf9b   :  { %568 = vrot.lane.b32.xlu1 %v564_v33, %s1027_s9 }
 0xfa3   :  { %670 = vrot.lane.b32.xlu1 %v849_v38, %s1028_s12 }
0x100d   :  { %v569_v35 = vpop.permute.xlu1 %568 }
0x100e   :  { %762 = vmatmul.msk.f32.vlgmr.msrb.gmra.mxu2 %vm112_vm0, %v569_v35 }
0x1015   :  { %v671_v51 = vpop.permute.xlu1 %670 }
0x1091   :  { %v589_v41 = vpop.f32.mrf.mxu2 }
0x1092   :  { %v592_v42 = vadd.f32 %v589_v41, %v199_v56 }
0x1094   :  { %850 = vtanh.f32 %v592_v42  ;;  %v593_v45 = vmul.f32 0.5, %v592_v42 }
0x1095   :  { %852 = vtanh.f32 %v664_v44 }
0x1096   :  { %854 = vtanh.f32 %v593_v45 }
0x109a   :  { %v851_v43 = vpop.eup %850 }
0x109b   :  { %600 = vrot.lane.b32.xlu2 %v851_v43, %s1024_s29  ;;  %v853_v46 = vpop.eup %852 }
0x109c   :  { %v666_v47 = vmul.f32 0.5, %v853_v46  ;;  %v855_v48 = vpop.eup %854 }
0x109d   :  { %v595_v50 = vmul.f32 0.5, %v855_v48 }
0x109e   :  { %v667_v49 = vadd.f32 0.5, %v666_v47 }
0x109f   :  { %v596_v52 = vadd.f32 0.5, %v595_v50 }
0x10a0   :  { %v673_v14 = vmul.f32 %v671_v51, %v667_v49 }
0x10a1   :  { %v598_v54 = vmul.f32 %v596_v52, %v558_v23 }
0x10a2   :  { %856 = vtanh.f32 %v673_v14 }
0x10a8   :  { %v857_v61 = vpop.eup %856 }
0x10f5   :  { %v601_v53 = vpop.permute.xlu2 %600 }
0x10f6   :  { %v603_v16 = vmul.f32 %v601_v53, %v596_v52 }
0x10f8   :  { %605 = vrot.lane.b32.xlu0 %v603_v16, %s1025_s30 }
0x1100   :  { %676 = vrot.lane.b32.xlu0 %v857_v61, %s1026_s3 }
0x116a   :  { %v606_v55 = vpop.permute.xlu0 %605 }
0x116b   :  { %v608_v57 = vadd.f32 %v606_v55, %v598_v54 }
0x116d   :  { %858 = vtanh.f32 %v608_v57 }
0x1172   :  { %v677_v59 = vpop.permute.xlu0 %676 }
0x1173   :  { %v859_v58 = vpop.eup %858  ;;  %v679_v60 = vmul.f32 %v677_v59, %v667_v49 }
0x1174   :  { %611 = vrot.lane.b32.xlu2 %v859_v58, %s1026_s3 }
0x117c   :  { %681 = vrot.lane.b32.xlu2 %v679_v60, %s1028_s12 }
0x1184   :  { %621 = vrot.lane.b32.xlu2 %v608_v57, %s1028_s12 }
0x11ce   :  { %v612_v2 = vpop.permute.xlu2 %611 }
0x11cf   :  { %v614_v3 = vmul.f32 %v612_v2, %v596_v52 }
0x11d1   :  { %616 = vrot.lane.b32.xlu1 %v614_v3, %s1027_s9 }
0x11d6   :  { %v682_v4 = vpop.permute.xlu2 %681 }
0x11de   :  { %v622_v5 = vpop.permute.xlu2 %621 }
0x11df   :  { %624 = vst.msk [vmem:[#allocation4] sm:$0xff] %vm112_vm0, %v622_v5 }
0x1243   :  { %v617_v39 = vpop.permute.xlu1 %616 }
0x1244   :  { %619 = vst.msk [vmem:[#allocation3] sm:$0xff] %vm112_vm0, %v617_v39  ;;  %v684_v6 = vsel %vm112_vm0, %v617_v39, %v682_v4 }
0x1245   :  { %764 = vmatmul.msk.f32.vlgmr.msra.gmra.mxu1 %vm693_vm2, %v684_v6 }
0x12c2   :  { %v714_v8 = vpop.f32.mrf.mxu1 }
0x12c3   :  { %v715_v9 = vadd.f32 %v805_v7, %v714_v8 }
0x12c5   :  { %717 = vmax.xlane.f32.xlu0 %v715_v9 }
0x1338   :  { %v718_v10 = vpop.xlane.xlu0 %717 }
0x1339   :  { %v719_v11 = vsub.f32 %v715_v9, %v718_v10 }
0x133b   :  { %v720_v12 = vmul.f32 1.442695, %v719_v11 }
0x133d   :  { %860 = vpow2.f32 %v720_v12 }
0x1343   :  { %v861_v13 = vpop.eup %860 }
0x1344   :  { %722 = vadd.xlane.f32.xlu1 %v861_v13 }
0x13b7   :  { %v723_v15 = vpop.xlane.xlu1 %722 }
0x13b8   :  { %862 = vlog2.f32 %v723_v15 }
0x13be   :  { %v863_v17 = vpop.eup %862 }
0x13bf   :  { %v725_v18 = vmul.f32 0.6931472, %v863_v17 }
0x13c1   :  { %v726_v19 = vsub.f32 %v719_v11, %v725_v18 }
0x13c3   :  { %727 = vst [vmem:[#allocation14] sm:$0xff] %v726_v19 }
0x13c4   :  { %738 = dma.vmem_to_hbm [thread:$0]  %s734_s15, 128, %s736_s18, [#allocation7]  }
0x13c5   :  { %1014 = dma.done.wait [#allocation7], 128  }
0x13c6   :  { %1015 = vsyncadd [#allocation7], 4294967168 }
0x13c7   :  { %743 = vsyncpa [#allocation6], 1 }
0x13c8   :  { %744 = vsyncpa [#allocation9], 1 }
0x13c9   :  { %745 = vsyncpa [#allocation12], 1 }
0x13ca   :  { %746 = vsyncpa [#allocation7], 1 }

</bundles_post_ra>
